<compile_context>
chip_gen: v5e
topology: v5e:2x2
jax: 0.10.0
libtpu: 0.0.40
codegen_flags: <defaults>
</compile_context>

<pallas_src>
import functools
import numpy as np
import jax
import jax.numpy as jnp
from jax import lax
from jax.experimental import pallas as pl
from jax.experimental.pallas import tpu as pltpu

BN_EPS = 1e-5
PAD = 128              # lane width; every feature dimension is zero-padded to this
W_PER_ENC = 12         # padded 128x128 weight matrices per encoder (after splitting)
V_PER_ENC = 17         # padded 128-wide bias/scale/shift rows per encoder


# ----------------------------- parameter init (PyTorch-like layout) ----------

def init_mlp(key, n_in, n_hid, n_out):
    """NRI MLP: fc1(n_in->n_hid), fc2(n_hid->n_out), BatchNorm1d(n_out) (eval)."""
    k1, k2 = jax.random.split(key)
    w1 = jax.random.normal(k1, (n_in, n_hid), jnp.float32) * (1.0 / np.sqrt(n_in))
    b1 = jnp.full((1, n_hid), 0.1, jnp.float32)
    w2 = jax.random.normal(k2, (n_hid, n_out), jnp.float32) * (1.0 / np.sqrt(n_hid))
    b2 = jnp.full((1, n_out), 0.1, jnp.float32)
    # BatchNorm1d eval with default running stats -> affine scale/shift
    scale = jnp.full((1, n_out), 1.0 / np.sqrt(1.0 + BN_EPS), jnp.float32)
    shift = jnp.zeros((1, n_out), jnp.float32)
    return [w1, b1, w2, b2, scale, shift]


def init_encoder(key, n_in, n_hid, n_out):
    """MLPEncoder params (flat list of 26 2-D arrays, PyTorch-equivalent layout)."""
    ks = jax.random.split(key, 5)
    p = []
    p += init_mlp(ks[0], n_in, n_hid, n_hid)            # mlp1
    p += init_mlp(ks[1], 2 * n_hid, n_hid, n_hid)       # mlp2
    p += init_mlp(ks[2], n_hid, n_hid, n_hid)           # mlp3
    p += init_mlp(ks[3], 3 * n_hid, n_hid, n_hid)       # mlp4
    w_out = jax.random.normal(ks[4], (n_hid, n_out), jnp.float32) * (1.0 / np.sqrt(n_hid))
    b_out = jnp.full((1, n_out), 0.1, jnp.float32)
    return p + [w_out, b_out]


# ----------------------------- parameter packing ------------------------------

def _pad_w(w):
    """(r, c) -> (PAD, PAD), zero padded (zeros keep padded lanes exactly zero)."""
    out = jnp.zeros((PAD, PAD), jnp.float32)
    return out.at[: w.shape[0], : w.shape[1]].set(w)


def _pad_v(v):
    """(1, c) -> (PAD,), zero padded."""
    out = jnp.zeros((PAD,), jnp.float32)
    return out.at[: v.shape[-1]].set(v.reshape(-1))


def _pack_encoder(params, nhid):
    """Pack one MLPEncoder's 26 arrays into 12 padded weights + 17 padded vectors.

    mlp2.w1 (2*nhid, nhid) and mlp4.w1 (3*nhid, nhid) are split so the in-kernel
    lane-axis concatenations become sums of dots.
    Weight order: [mlp1.w1, mlp1.w2, mlp2.w1a, mlp2.w1b, mlp2.w2, mlp3.w1, mlp3.w2,
                   mlp4.w1a, mlp4.w1b, mlp4.w1c, mlp4.w2, fc_out.w]
    Vector order: [mlp1 b1,b2,scale,shift, mlp2 ..., mlp3 ..., mlp4 ..., fc_out.b]
    """
    weights, vectors = [], []
    # mlp1
    weights += [_pad_w(params[0]), _pad_w(params[2])]
    vectors += [_pad_v(params[1]), _pad_v(params[3]), _pad_v(params[4]), _pad_v(params[5])]
    # mlp2 (first weight split: senders half, receivers half)
    w1 = params[6]
    weights += [_pad_w(w1[:nhid]), _pad_w(w1[nhid:]), _pad_w(params[8])]
    vectors += [_pad_v(params[7]), _pad_v(params[9]), _pad_v(params[10]), _pad_v(params[11])]
    # mlp3
    weights += [_pad_w(params[12]), _pad_w(params[14])]
    vectors += [_pad_v(params[13]), _pad_v(params[15]), _pad_v(params[16]), _pad_v(params[17])]
    # mlp4 (first weight split: senders / receivers / skip thirds)
    w1 = params[18]
    weights += [_pad_w(w1[:nhid]), _pad_w(w1[nhid:2 * nhid]),
                _pad_w(w1[2 * nhid:]), _pad_w(params[20])]
    vectors += [_pad_v(params[19]), _pad_v(params[21]), _pad_v(params[22]), _pad_v(params[23])]
    # fc_out
    weights += [_pad_w(params[24])]
    vectors += [_pad_v(params[25])]
    assert len(weights) == W_PER_ENC and len(vectors) == V_PER_ENC
    return weights, vectors


def pack_params(params_gc1, params_gc2, nhid):
    w1, v1 = _pack_encoder(params_gc1, nhid)
    w2, v2 = _pack_encoder(params_gc2, nhid)
    w_slab = jnp.stack(w1 + w2)                       # (24, 128, 128)
    v = jnp.stack(v1 + v2)                            # (34, 128)
    pad_rows = (-v.shape[0]) % 8                      # sublane-align the vector slab
    v_slab = jnp.pad(v, ((0, pad_rows), (0, 0)))      # (40, 128)
    return w_slab, v_slab


# ------------------------------ fused Pallas kernel ---------------------------

def _fused_kernel(x_ref, adj_ref, w_ref, v_ref, o_ref, *, nclass):
    x = x_ref[...]            # (N, 128) zero-padded node features
    adj = adj_ref[...]        # (N, N)   rel_rec = adj, rel_send = adj.T (never materialized)
    inv_n = 1.0 / adj_ref.shape[0]

    def dotf(a, b):
        return jnp.dot(a, b, preferred_element_type=jnp.float32)

    def adj_t_dot(h):
        # adj.T @ h via contraction over adj's leading axis (no transpose / no extra DMA)
        return lax.dot_general(adj, h, (((0,), (0,)), ((), ())),
                               preferred_element_type=jnp.float32)

    def elu(v):
        return jnp.where(v > 0.0, v, jnp.exp(jnp.minimum(v, 0.0)) - 1.0)

    def mlp_tail(z, w2_idx, vo):
        # z is the pre-bias first-layer matmul result; finish two-layer ELU MLP
        # plus eval-mode BatchNorm (affine scale/shift).
        h = elu(z + v_ref[vo])
        h = elu(dotf(h, w_ref[w2_idx]) + v_ref[vo + 1])
        return h * v_ref[vo + 2] + v_ref[vo + 3]

    def encoder(h_in, wo, vo, apply_relu):
        # mlp1
        h = mlp_tail(dotf(h_in, w_ref[wo + 0]), wo + 1, vo + 0)
        # node2edge: senders = adj.T @ h, receivers = adj @ h.
        # mlp2 over concat([senders, receivers]) == summed split-weight dots.
        send = adj_t_dot(h)
        recv = dotf(adj, h)
        h = mlp_tail(dotf(send, w_ref[wo + 2]) + dotf(recv, w_ref[wo + 3]),
                     wo + 4, vo + 4)
        skip = h
        # edge2node: adj.T @ h / N  (adj is square, so #edges == #nodes == N)
        h = mlp_tail(dotf(adj_t_dot(h) * inv_n, w_ref[wo + 5]), wo + 6, vo + 8)
        # node2edge again; mlp4 over concat([senders, receivers, skip]).
        send2 = adj_t_dot(h)
        recv2 = dotf(adj, h)
        h = mlp_tail(dotf(send2, w_ref[wo + 7]) + dotf(recv2, w_ref[wo + 8])
                     + dotf(skip, w_ref[wo + 9]), wo + 10, vo + 12)
        # fc_out
        out = dotf(h, w_ref[wo + 11]) + v_ref[vo + 16]
        return jnp.maximum(out, 0.0) if apply_relu else out

    h1 = encoder(x, 0, 0, True)                          # relu(gc1(x)); dropout = identity (eval)
    logits = encoder(h1, W_PER_ENC, V_PER_ENC, False)    # gc2(h)

    # log_softmax(dim=1) over the first `nclass` lanes (rest is lane padding)
    lane = lax.broadcasted_iota(jnp.int32, logits.shape, 1)
    valid = lane < nclass
    masked = jnp.where(valid, logits, jnp.float32(-1e30))
    m = jnp.max(masked, axis=1, keepdims=True)
    s = jnp.sum(jnp.where(valid, jnp.exp(masked - m), 0.0), axis=1, keepdims=True)
    lse = jnp.log(s) + m
    o_ref[...] = jnp.where(valid, logits - lse, 0.0)


def gcn_evolution_forward(x, adj, params_gc1, params_gc2, nhid, nclass):
    """x: (B, N, nfeat); adj: (N, N). Eval mode (dropout = identity). B must be 1
    (the module's .squeeze() + log_softmax(dim=1) implies per-node class scores)."""
    B, N, nfeat = x.shape
    assert B == 1, "squeeze()+log_softmax(dim=1) path implemented for B=1"
    # TODO(synk): B>1 changes the module's semantics (log_softmax over nodes); not implemented.
    assert max(nfeat, nhid, nclass) <= PAD

    w_slab, v_slab = pack_params(params_gc1, params_gc2, nhid)
    x_pad = jnp.zeros((N, PAD), jnp.float32).at[:, :nfeat].set(x[0])

    out = pl.pallas_call(
        functools.partial(_fused_kernel, nclass=nclass),
        out_shape=jax.ShapeDtypeStruct((N, PAD), jnp.float32),
        in_specs=[pl.BlockSpec(memory_space=pltpu.MemorySpace.VMEM)] * 4,
        out_specs=pl.BlockSpec(memory_space=pltpu.MemorySpace.VMEM),
    )(x_pad, adj.astype(jnp.float32), w_slab, v_slab)

    return out[:, :nclass]


# ------------------------------ pure-JAX reference ----------------------------

def _mlp_ref(h, p):
    w1, b1, w2, b2, s, t = p
    h = jax.nn.elu(h @ w1 + b1)
    h = jax.nn.elu(h @ w2 + b2)
    return h * s + t


def _encoder_ref(x, rr, rs, params, apply_relu):
    def per(xb):
        h = _mlp_ref(xb, params[0:6])
        e = jnp.concatenate([rs @ h, rr @ h], axis=1)
        h = _mlp_ref(e, params[6:12])
        skip = h
        inc = rr.T @ h / h.shape[0]
        h = _mlp_ref(inc, params[12:18])
        e2 = jnp.concatenate([rs @ h, rr @ h], axis=1)
        h = _mlp_ref(jnp.concatenate([e2, skip], axis=1), params[18:24])
        out = h @ params[24] + params[25]
        return jnp.maximum(out, 0.0) if apply_relu else out
    return jax.vmap(per)(x)


def _forward_ref(x, adj, p1, p2):
    h = _encoder_ref(x, adj, adj.T, p1, True)
    logits = jnp.squeeze(_encoder_ref(h, adj, adj.T, p2, False))
    return jax.nn.log_softmax(logits, axis=1)


# ----------------------------------- main -------------------------------------

if __name__ == "__main__":
    B, N = 1, 16          # B=1 so .squeeze() yields (N, nclass) as the module implies
    nfeat, nhid, nclass = 8, 32, 8
    dropout = 0.5         # unused in eval mode

    key = jax.random.PRNGKey(0)
    kx, ka, k1, k2 = jax.random.split(key, 4)
    x = jax.random.normal(kx, (B, N, nfeat), jnp.float32)
    adj = jax.random.uniform(ka, (N, N), jnp.float32)

    params_gc1 = init_encoder(k1, nfeat, nhid, nhid)     # gc1 = MLPEncoder(nfeat, nhid, nhid)
    params_gc2 = init_encoder(k2, nhid, nhid, nclass)    # gc2 = MLPEncoder(nhid, nhid, nclass)

    out = gcn_evolution_forward(x, adj, params_gc1, params_gc2, nhid, nclass)
    out = jax.block_until_ready(out)

    ref = jax.block_until_ready(_forward_ref(x, adj, params_gc1, params_gc2))
    np.testing.assert_allclose(np.asarray(out), np.asarray(ref), rtol=1e-3, atol=1e-4)

    print("KERNEL_OK")
</pallas_src>

<mosaic_0001>
module attributes {stable_mosaic.version = 11 : i64} {
  func.func @_fused_kernel(%arg0: memref<16x128xf32, #tpu.memory_space<vmem>>, %arg1: memref<16x16xf32, #tpu.memory_space<vmem>>, %arg2: memref<24x128x128xf32, #tpu.memory_space<vmem>>, %arg3: memref<40x128xf32, #tpu.memory_space<vmem>>, %arg4: memref<16x128xf32, #tpu.memory_space<vmem>>) attributes {dimension_semantics = [], scalar_prefetch = 0 : i64, scratch_operands = 0 : i64, tpu.core_type = #tpu.core_type<tc>} {
    %c0 = arith.constant 0 : index
    %c0_0 = arith.constant 0 : index
    %0 = vector.load %arg0[%c0, %c0_0] : memref<16x128xf32, #tpu.memory_space<vmem>>, vector<16x128xf32>
    %c0_1 = arith.constant 0 : index
    %c0_2 = arith.constant 0 : index
    %1 = vector.load %arg1[%c0_1, %c0_2] : memref<16x16xf32, #tpu.memory_space<vmem>>, vector<16x16xf32>
    %c0_3 = arith.constant 0 : index
    %c0_4 = arith.constant 0 : index
    %c0_5 = arith.constant 0 : index
    %2 = vector.load %arg2[%c0_3, %c0_4, %c0_5] : memref<24x128x128xf32, #tpu.memory_space<vmem>>, vector<1x128x128xf32>
    %3 = vector.shape_cast %2 : vector<1x128x128xf32> to vector<128x128xf32>
    %cst = arith.constant dense<0.000000e+00> : vector<16x128xf32>
    %4 = tpu.matmul %0, %3, %cst {dimension_numbers = #tpu.dot_dimension_numbers<[1], [0], [0], [1], [0, 0, 1, 1], [], []>} : vector<16x128xf32>, vector<128x128xf32>, vector<16x128xf32> -> vector<16x128xf32>
    %c0_6 = arith.constant 0 : index
    %c0_7 = arith.constant 0 : index
    %5 = vector.load %arg3[%c0_6, %c0_7] : memref<40x128xf32, #tpu.memory_space<vmem>>, vector<1x128xf32>
    %6 = vector.shape_cast %5 : vector<1x128xf32> to vector<128xf32>
    %7 = vector.shape_cast %6 : vector<128xf32> to vector<1x128xf32>
    %8 = vector.broadcast %7 : vector<1x128xf32> to vector<16x128xf32>
    %9 = arith.addf %4, %8 : vector<16x128xf32>
    %cst_8 = arith.constant 0.000000e+00 : f32
    %10 = vector.broadcast %cst_8 : f32 to vector<16x128xf32>
    %11 = arith.cmpf ogt, %9, %10 : vector<16x128xf32>
    %cst_9 = arith.constant 0.000000e+00 : f32
    %12 = vector.broadcast %cst_9 : f32 to vector<16x128xf32>
    %13 = arith.minimumf %9, %12 : vector<16x128xf32>
    %14 = math.exp %13 : vector<16x128xf32>
    %cst_10 = arith.constant 1.000000e+00 : f32
    %15 = vector.broadcast %cst_10 : f32 to vector<16x128xf32>
    %16 = arith.subf %14, %15 : vector<16x128xf32>
    %17 = arith.select %11, %9, %16 : vector<16x128xi1>, vector<16x128xf32>
    %c1 = arith.constant 1 : index
    %c0_11 = arith.constant 0 : index
    %c0_12 = arith.constant 0 : index
    %18 = vector.load %arg2[%c1, %c0_11, %c0_12] : memref<24x128x128xf32, #tpu.memory_space<vmem>>, vector<1x128x128xf32>
    %19 = vector.shape_cast %18 : vector<1x128x128xf32> to vector<128x128xf32>
    %cst_13 = arith.constant dense<0.000000e+00> : vector<16x128xf32>
    %20 = tpu.matmul %17, %19, %cst_13 {dimension_numbers = #tpu.dot_dimension_numbers<[1], [0], [0], [1], [0, 0, 1, 1], [], []>} : vector<16x128xf32>, vector<128x128xf32>, vector<16x128xf32> -> vector<16x128xf32>
    %c1_14 = arith.constant 1 : index
    %c0_15 = arith.constant 0 : index
    %21 = vector.load %arg3[%c1_14, %c0_15] : memref<40x128xf32, #tpu.memory_space<vmem>>, vector<1x128xf32>
    %22 = vector.shape_cast %21 : vector<1x128xf32> to vector<128xf32>
    %23 = vector.shape_cast %22 : vector<128xf32> to vector<1x128xf32>
    %24 = vector.broadcast %23 : vector<1x128xf32> to vector<16x128xf32>
    %25 = arith.addf %20, %24 : vector<16x128xf32>
    %cst_16 = arith.constant 0.000000e+00 : f32
    %26 = vector.broadcast %cst_16 : f32 to vector<16x128xf32>
    %27 = arith.cmpf ogt, %25, %26 : vector<16x128xf32>
    %cst_17 = arith.constant 0.000000e+00 : f32
    %28 = vector.broadcast %cst_17 : f32 to vector<16x128xf32>
    %29 = arith.minimumf %25, %28 : vector<16x128xf32>
    %30 = math.exp %29 : vector<16x128xf32>
    %cst_18 = arith.constant 1.000000e+00 : f32
    %31 = vector.broadcast %cst_18 : f32 to vector<16x128xf32>
    %32 = arith.subf %30, %31 : vector<16x128xf32>
    %33 = arith.select %27, %25, %32 : vector<16x128xi1>, vector<16x128xf32>
    %c2 = arith.constant 2 : index
    %c0_19 = arith.constant 0 : index
    %34 = vector.load %arg3[%c2, %c0_19] : memref<40x128xf32, #tpu.memory_space<vmem>>, vector<1x128xf32>
    %35 = vector.shape_cast %34 : vector<1x128xf32> to vector<128xf32>
    %36 = vector.shape_cast %35 : vector<128xf32> to vector<1x128xf32>
    %37 = vector.broadcast %36 : vector<1x128xf32> to vector<16x128xf32>
    %38 = arith.mulf %33, %37 : vector<16x128xf32>
    %c3 = arith.constant 3 : index
    %c0_20 = arith.constant 0 : index
    %39 = vector.load %arg3[%c3, %c0_20] : memref<40x128xf32, #tpu.memory_space<vmem>>, vector<1x128xf32>
    %40 = vector.shape_cast %39 : vector<1x128xf32> to vector<128xf32>
    %41 = vector.shape_cast %40 : vector<128xf32> to vector<1x128xf32>
    %42 = vector.broadcast %41 : vector<1x128xf32> to vector<16x128xf32>
    %43 = arith.addf %38, %42 : vector<16x128xf32>
    %cst_21 = arith.constant dense<0.000000e+00> : vector<16x128xf32>
    %44 = tpu.matmul %1, %43, %cst_21 {dimension_numbers = #tpu.dot_dimension_numbers<[0], [0], [1], [1], [0, 1, 1, 1], [], []>} : vector<16x16xf32>, vector<16x128xf32>, vector<16x128xf32> -> vector<16x128xf32>
    %cst_22 = arith.constant dense<0.000000e+00> : vector<16x128xf32>
    %45 = tpu.matmul %1, %43, %cst_22 {dimension_numbers = #tpu.dot_dimension_numbers<[1], [0], [0], [1], [0, 0, 1, 1], [], []>} : vector<16x16xf32>, vector<16x128xf32>, vector<16x128xf32> -> vector<16x128xf32>
    %c2_23 = arith.constant 2 : index
    %c0_24 = arith.constant 0 : index
    %c0_25 = arith.constant 0 : index
    %46 = vector.load %arg2[%c2_23, %c0_24, %c0_25] : memref<24x128x128xf32, #tpu.memory_space<vmem>>, vector<1x128x128xf32>
    %47 = vector.shape_cast %46 : vector<1x128x128xf32> to vector<128x128xf32>
    %cst_26 = arith.constant dense<0.000000e+00> : vector<16x128xf32>
    %48 = tpu.matmul %44, %47, %cst_26 {dimension_numbers = #tpu.dot_dimension_numbers<[1], [0], [0], [1], [0, 0, 1, 1], [], []>} : vector<16x128xf32>, vector<128x128xf32>, vector<16x128xf32> -> vector<16x128xf32>
    %c3_27 = arith.constant 3 : index
    %c0_28 = arith.constant 0 : index
    %c0_29 = arith.constant 0 : index
    %49 = vector.load %arg2[%c3_27, %c0_28, %c0_29] : memref<24x128x128xf32, #tpu.memory_space<vmem>>, vector<1x128x128xf32>
    %50 = vector.shape_cast %49 : vector<1x128x128xf32> to vector<128x128xf32>
    %cst_30 = arith.constant dense<0.000000e+00> : vector<16x128xf32>
    %51 = tpu.matmul %45, %50, %cst_30 {dimension_numbers = #tpu.dot_dimension_numbers<[1], [0], [0], [1], [0, 0, 1, 1], [], []>} : vector<16x128xf32>, vector<128x128xf32>, vector<16x128xf32> -> vector<16x128xf32>
    %52 = arith.addf %48, %51 : vector<16x128xf32>
    %c4 = arith.constant 4 : index
    %c0_31 = arith.constant 0 : index
    %53 = vector.load %arg3[%c4, %c0_31] : memref<40x128xf32, #tpu.memory_space<vmem>>, vector<1x128xf32>
    %54 = vector.shape_cast %53 : vector<1x128xf32> to vector<128xf32>
    %55 = vector.shape_cast %54 : vector<128xf32> to vector<1x128xf32>
    %56 = vector.broadcast %55 : vector<1x128xf32> to vector<16x128xf32>
    %57 = arith.addf %52, %56 : vector<16x128xf32>
    %cst_32 = arith.constant 0.000000e+00 : f32
    %58 = vector.broadcast %cst_32 : f32 to vector<16x128xf32>
    %59 = arith.cmpf ogt, %57, %58 : vector<16x128xf32>
    %cst_33 = arith.constant 0.000000e+00 : f32
    %60 = vector.broadcast %cst_33 : f32 to vector<16x128xf32>
    %61 = arith.minimumf %57, %60 : vector<16x128xf32>
    %62 = math.exp %61 : vector<16x128xf32>
    %cst_34 = arith.constant 1.000000e+00 : f32
    %63 = vector.broadcast %cst_34 : f32 to vector<16x128xf32>
    %64 = arith.subf %62, %63 : vector<16x128xf32>
    %65 = arith.select %59, %57, %64 : vector<16x128xi1>, vector<16x128xf32>
    %c4_35 = arith.constant 4 : index
    %c0_36 = arith.constant 0 : index
    %c0_37 = arith.constant 0 : index
    %66 = vector.load %arg2[%c4_35, %c0_36, %c0_37] : memref<24x128x128xf32, #tpu.memory_space<vmem>>, vector<1x128x128xf32>
    %67 = vector.shape_cast %66 : vector<1x128x128xf32> to vector<128x128xf32>
    %cst_38 = arith.constant dense<0.000000e+00> : vector<16x128xf32>
    %68 = tpu.matmul %65, %67, %cst_38 {dimension_numbers = #tpu.dot_dimension_numbers<[1], [0], [0], [1], [0, 0, 1, 1], [], []>} : vector<16x128xf32>, vector<128x128xf32>, vector<16x128xf32> -> vector<16x128xf32>
    %c5 = arith.constant 5 : index
    %c0_39 = arith.constant 0 : index
    %69 = vector.load %arg3[%c5, %c0_39] : memref<40x128xf32, #tpu.memory_space<vmem>>, vector<1x128xf32>
    %70 = vector.shape_cast %69 : vector<1x128xf32> to vector<128xf32>
    %71 = vector.shape_cast %70 : vector<128xf32> to vector<1x128xf32>
    %72 = vector.broadcast %71 : vector<1x128xf32> to vector<16x128xf32>
    %73 = arith.addf %68, %72 : vector<16x128xf32>
    %cst_40 = arith.constant 0.000000e+00 : f32
    %74 = vector.broadcast %cst_40 : f32 to vector<16x128xf32>
    %75 = arith.cmpf ogt, %73, %74 : vector<16x128xf32>
    %cst_41 = arith.constant 0.000000e+00 : f32
    %76 = vector.broadcast %cst_41 : f32 to vector<16x128xf32>
    %77 = arith.minimumf %73, %76 : vector<16x128xf32>
    %78 = math.exp %77 : vector<16x128xf32>
    %cst_42 = arith.constant 1.000000e+00 : f32
    %79 = vector.broadcast %cst_42 : f32 to vector<16x128xf32>
    %80 = arith.subf %78, %79 : vector<16x128xf32>
    %81 = arith.select %75, %73, %80 : vector<16x128xi1>, vector<16x128xf32>
    %c6 = arith.constant 6 : index
    %c0_43 = arith.constant 0 : index
    %82 = vector.load %arg3[%c6, %c0_43] : memref<40x128xf32, #tpu.memory_space<vmem>>, vector<1x128xf32>
    %83 = vector.shape_cast %82 : vector<1x128xf32> to vector<128xf32>
    %84 = vector.shape_cast %83 : vector<128xf32> to vector<1x128xf32>
    %85 = vector.broadcast %84 : vector<1x128xf32> to vector<16x128xf32>
    %86 = arith.mulf %81, %85 : vector<16x128xf32>
    %c7 = arith.constant 7 : index
    %c0_44 = arith.constant 0 : index
    %87 = vector.load %arg3[%c7, %c0_44] : memref<40x128xf32, #tpu.memory_space<vmem>>, vector<1x128xf32>
    %88 = vector.shape_cast %87 : vector<1x128xf32> to vector<128xf32>
    %89 = vector.shape_cast %88 : vector<128xf32> to vector<1x128xf32>
    %90 = vector.broadcast %89 : vector<1x128xf32> to vector<16x128xf32>
    %91 = arith.addf %86, %90 : vector<16x128xf32>
    %cst_45 = arith.constant dense<0.000000e+00> : vector<16x128xf32>
    %92 = tpu.matmul %1, %91, %cst_45 {dimension_numbers = #tpu.dot_dimension_numbers<[0], [0], [1], [1], [0, 1, 1, 1], [], []>} : vector<16x16xf32>, vector<16x128xf32>, vector<16x128xf32> -> vector<16x128xf32>
    %cst_46 = arith.constant 6.250000e-02 : f32
    %93 = vector.broadcast %cst_46 : f32 to vector<16x128xf32>
    %94 = arith.mulf %92, %93 : vector<16x128xf32>
    %c5_47 = arith.constant 5 : index
    %c0_48 = arith.constant 0 : index
    %c0_49 = arith.constant 0 : index
    %95 = vector.load %arg2[%c5_47, %c0_48, %c0_49] : memref<24x128x128xf32, #tpu.memory_space<vmem>>, vector<1x128x128xf32>
    %96 = vector.shape_cast %95 : vector<1x128x128xf32> to vector<128x128xf32>
    %cst_50 = arith.constant dense<0.000000e+00> : vector<16x128xf32>
    %97 = tpu.matmul %94, %96, %cst_50 {dimension_numbers = #tpu.dot_dimension_numbers<[1], [0], [0], [1], [0, 0, 1, 1], [], []>} : vector<16x128xf32>, vector<128x128xf32>, vector<16x128xf32> -> vector<16x128xf32>
    %c8 = arith.constant 8 : index
    %c0_51 = arith.constant 0 : index
    %98 = vector.load %arg3[%c8, %c0_51] : memref<40x128xf32, #tpu.memory_space<vmem>>, vector<1x128xf32>
    %99 = vector.shape_cast %98 : vector<1x128xf32> to vector<128xf32>
    %100 = vector.shape_cast %99 : vector<128xf32> to vector<1x128xf32>
    %101 = vector.broadcast %100 : vector<1x128xf32> to vector<16x128xf32>
    %102 = arith.addf %97, %101 : vector<16x128xf32>
    %cst_52 = arith.constant 0.000000e+00 : f32
    %103 = vector.broadcast %cst_52 : f32 to vector<16x128xf32>
    %104 = arith.cmpf ogt, %102, %103 : vector<16x128xf32>
    %cst_53 = arith.constant 0.000000e+00 : f32
    %105 = vector.broadcast %cst_53 : f32 to vector<16x128xf32>
    %106 = arith.minimumf %102, %105 : vector<16x128xf32>
    %107 = math.exp %106 : vector<16x128xf32>
    %cst_54 = arith.constant 1.000000e+00 : f32
    %108 = vector.broadcast %cst_54 : f32 to vector<16x128xf32>
    %109 = arith.subf %107, %108 : vector<16x128xf32>
    %110 = arith.select %104, %102, %109 : vector<16x128xi1>, vector<16x128xf32>
    %c6_55 = arith.constant 6 : index
    %c0_56 = arith.constant 0 : index
    %c0_57 = arith.constant 0 : index
    %111 = vector.load %arg2[%c6_55, %c0_56, %c0_57] : memref<24x128x128xf32, #tpu.memory_space<vmem>>, vector<1x128x128xf32>
    %112 = vector.shape_cast %111 : vector<1x128x128xf32> to vector<128x128xf32>
    %cst_58 = arith.constant dense<0.000000e+00> : vector<16x128xf32>
    %113 = tpu.matmul %110, %112, %cst_58 {dimension_numbers = #tpu.dot_dimension_numbers<[1], [0], [0], [1], [0, 0, 1, 1], [], []>} : vector<16x128xf32>, vector<128x128xf32>, vector<16x128xf32> -> vector<16x128xf32>
    %c9 = arith.constant 9 : index
    %c0_59 = arith.constant 0 : index
    %114 = vector.load %arg3[%c9, %c0_59] : memref<40x128xf32, #tpu.memory_space<vmem>>, vector<1x128xf32>
    %115 = vector.shape_cast %114 : vector<1x128xf32> to vector<128xf32>
    %116 = vector.shape_cast %115 : vector<128xf32> to vector<1x128xf32>
    %117 = vector.broadcast %116 : vector<1x128xf32> to vector<16x128xf32>
    %118 = arith.addf %113, %117 : vector<16x128xf32>
    %cst_60 = arith.constant 0.000000e+00 : f32
    %119 = vector.broadcast %cst_60 : f32 to vector<16x128xf32>
    %120 = arith.cmpf ogt, %118, %119 : vector<16x128xf32>
    %cst_61 = arith.constant 0.000000e+00 : f32
    %121 = vector.broadcast %cst_61 : f32 to vector<16x128xf32>
    %122 = arith.minimumf %118, %121 : vector<16x128xf32>
    %123 = math.exp %122 : vector<16x128xf32>
    %cst_62 = arith.constant 1.000000e+00 : f32
    %124 = vector.broadcast %cst_62 : f32 to vector<16x128xf32>
    %125 = arith.subf %123, %124 : vector<16x128xf32>
    %126 = arith.select %120, %118, %125 : vector<16x128xi1>, vector<16x128xf32>
    %c10 = arith.constant 10 : index
    %c0_63 = arith.constant 0 : index
    %127 = vector.load %arg3[%c10, %c0_63] : memref<40x128xf32, #tpu.memory_space<vmem>>, vector<1x128xf32>
    %128 = vector.shape_cast %127 : vector<1x128xf32> to vector<128xf32>
    %129 = vector.shape_cast %128 : vector<128xf32> to vector<1x128xf32>
    %130 = vector.broadcast %129 : vector<1x128xf32> to vector<16x128xf32>
    %131 = arith.mulf %126, %130 : vector<16x128xf32>
    %c11 = arith.constant 11 : index
    %c0_64 = arith.constant 0 : index
    %132 = vector.load %arg3[%c11, %c0_64] : memref<40x128xf32, #tpu.memory_space<vmem>>, vector<1x128xf32>
    %133 = vector.shape_cast %132 : vector<1x128xf32> to vector<128xf32>
    %134 = vector.shape_cast %133 : vector<128xf32> to vector<1x128xf32>
    %135 = vector.broadcast %134 : vector<1x128xf32> to vector<16x128xf32>
    %136 = arith.addf %131, %135 : vector<16x128xf32>
    %cst_65 = arith.constant dense<0.000000e+00> : vector<16x128xf32>
    %137 = tpu.matmul %1, %136, %cst_65 {dimension_numbers = #tpu.dot_dimension_numbers<[0], [0], [1], [1], [0, 1, 1, 1], [], []>} : vector<16x16xf32>, vector<16x128xf32>, vector<16x128xf32> -> vector<16x128xf32>
    %cst_66 = arith.constant dense<0.000000e+00> : vector<16x128xf32>
    %138 = tpu.matmul %1, %136, %cst_66 {dimension_numbers = #tpu.dot_dimension_numbers<[1], [0], [0], [1], [0, 0, 1, 1], [], []>} : vector<16x16xf32>, vector<16x128xf32>, vector<16x128xf32> -> vector<16x128xf32>
    %c7_67 = arith.constant 7 : index
    %c0_68 = arith.constant 0 : index
    %c0_69 = arith.constant 0 : index
    %139 = vector.load %arg2[%c7_67, %c0_68, %c0_69] : memref<24x128x128xf32, #tpu.memory_space<vmem>>, vector<1x128x128xf32>
    %140 = vector.shape_cast %139 : vector<1x128x128xf32> to vector<128x128xf32>
    %cst_70 = arith.constant dense<0.000000e+00> : vector<16x128xf32>
    %141 = tpu.matmul %137, %140, %cst_70 {dimension_numbers = #tpu.dot_dimension_numbers<[1], [0], [0], [1], [0, 0, 1, 1], [], []>} : vector<16x128xf32>, vector<128x128xf32>, vector<16x128xf32> -> vector<16x128xf32>
    %c8_71 = arith.constant 8 : index
    %c0_72 = arith.constant 0 : index
    %c0_73 = arith.constant 0 : index
    %142 = vector.load %arg2[%c8_71, %c0_72, %c0_73] : memref<24x128x128xf32, #tpu.memory_space<vmem>>, vector<1x128x128xf32>
    %143 = vector.shape_cast %142 : vector<1x128x128xf32> to vector<128x128xf32>
    %cst_74 = arith.constant dense<0.000000e+00> : vector<16x128xf32>
    %144 = tpu.matmul %138, %143, %cst_74 {dimension_numbers = #tpu.dot_dimension_numbers<[1], [0], [0], [1], [0, 0, 1, 1], [], []>} : vector<16x128xf32>, vector<128x128xf32>, vector<16x128xf32> -> vector<16x128xf32>
    %145 = arith.addf %141, %144 : vector<16x128xf32>
    %c9_75 = arith.constant 9 : index
    %c0_76 = arith.constant 0 : index
    %c0_77 = arith.constant 0 : index
    %146 = vector.load %arg2[%c9_75, %c0_76, %c0_77] : memref<24x128x128xf32, #tpu.memory_space<vmem>>, vector<1x128x128xf32>
    %147 = vector.shape_cast %146 : vector<1x128x128xf32> to vector<128x128xf32>
    %cst_78 = arith.constant dense<0.000000e+00> : vector<16x128xf32>
    %148 = tpu.matmul %91, %147, %cst_78 {dimension_numbers = #tpu.dot_dimension_numbers<[1], [0], [0], [1], [0, 0, 1, 1], [], []>} : vector<16x128xf32>, vector<128x128xf32>, vector<16x128xf32> -> vector<16x128xf32>
    %149 = arith.addf %145, %148 : vector<16x128xf32>
    %c12 = arith.constant 12 : index
    %c0_79 = arith.constant 0 : index
    %150 = vector.load %arg3[%c12, %c0_79] : memref<40x128xf32, #tpu.memory_space<vmem>>, vector<1x128xf32>
    %151 = vector.shape_cast %150 : vector<1x128xf32> to vector<128xf32>
    %152 = vector.shape_cast %151 : vector<128xf32> to vector<1x128xf32>
    %153 = vector.broadcast %152 : vector<1x128xf32> to vector<16x128xf32>
    %154 = arith.addf %149, %153 : vector<16x128xf32>
    %cst_80 = arith.constant 0.000000e+00 : f32
    %155 = vector.broadcast %cst_80 : f32 to vector<16x128xf32>
    %156 = arith.cmpf ogt, %154, %155 : vector<16x128xf32>
    %cst_81 = arith.constant 0.000000e+00 : f32
    %157 = vector.broadcast %cst_81 : f32 to vector<16x128xf32>
    %158 = arith.minimumf %154, %157 : vector<16x128xf32>
    %159 = math.exp %158 : vector<16x128xf32>
    %cst_82 = arith.constant 1.000000e+00 : f32
    %160 = vector.broadcast %cst_82 : f32 to vector<16x128xf32>
    %161 = arith.subf %159, %160 : vector<16x128xf32>
    %162 = arith.select %156, %154, %161 : vector<16x128xi1>, vector<16x128xf32>
    %c10_83 = arith.constant 10 : index
    %c0_84 = arith.constant 0 : index
    %c0_85 = arith.constant 0 : index
    %163 = vector.load %arg2[%c10_83, %c0_84, %c0_85] : memref<24x128x128xf32, #tpu.memory_space<vmem>>, vector<1x128x128xf32>
    %164 = vector.shape_cast %163 : vector<1x128x128xf32> to vector<128x128xf32>
    %cst_86 = arith.constant dense<0.000000e+00> : vector<16x128xf32>
    %165 = tpu.matmul %162, %164, %cst_86 {dimension_numbers = #tpu.dot_dimension_numbers<[1], [0], [0], [1], [0, 0, 1, 1], [], []>} : vector<16x128xf32>, vector<128x128xf32>, vector<16x128xf32> -> vector<16x128xf32>
    %c13 = arith.constant 13 : index
    %c0_87 = arith.constant 0 : index
    %166 = vector.load %arg3[%c13, %c0_87] : memref<40x128xf32, #tpu.memory_space<vmem>>, vector<1x128xf32>
    %167 = vector.shape_cast %166 : vector<1x128xf32> to vector<128xf32>
    %168 = vector.shape_cast %167 : vector<128xf32> to vector<1x128xf32>
    %169 = vector.broadcast %168 : vector<1x128xf32> to vector<16x128xf32>
    %170 = arith.addf %165, %169 : vector<16x128xf32>
    %cst_88 = arith.constant 0.000000e+00 : f32
    %171 = vector.broadcast %cst_88 : f32 to vector<16x128xf32>
    %172 = arith.cmpf ogt, %170, %171 : vector<16x128xf32>
    %cst_89 = arith.constant 0.000000e+00 : f32
    %173 = vector.broadcast %cst_89 : f32 to vector<16x128xf32>
    %174 = arith.minimumf %170, %173 : vector<16x128xf32>
    %175 = math.exp %174 : vector<16x128xf32>
    %cst_90 = arith.constant 1.000000e+00 : f32
    %176 = vector.broadcast %cst_90 : f32 to vector<16x128xf32>
    %177 = arith.subf %175, %176 : vector<16x128xf32>
    %178 = arith.select %172, %170, %177 : vector<16x128xi1>, vector<16x128xf32>
    %c14 = arith.constant 14 : index
    %c0_91 = arith.constant 0 : index
    %179 = vector.load %arg3[%c14, %c0_91] : memref<40x128xf32, #tpu.memory_space<vmem>>, vector<1x128xf32>
    %180 = vector.shape_cast %179 : vector<1x128xf32> to vector<128xf32>
    %181 = vector.shape_cast %180 : vector<128xf32> to vector<1x128xf32>
    %182 = vector.broadcast %181 : vector<1x128xf32> to vector<16x128xf32>
    %183 = arith.mulf %178, %182 : vector<16x128xf32>
    %c15 = arith.constant 15 : index
    %c0_92 = arith.constant 0 : index
    %184 = vector.load %arg3[%c15, %c0_92] : memref<40x128xf32, #tpu.memory_space<vmem>>, vector<1x128xf32>
    %185 = vector.shape_cast %184 : vector<1x128xf32> to vector<128xf32>
    %186 = vector.shape_cast %185 : vector<128xf32> to vector<1x128xf32>
    %187 = vector.broadcast %186 : vector<1x128xf32> to vector<16x128xf32>
    %188 = arith.addf %183, %187 : vector<16x128xf32>
    %c11_93 = arith.constant 11 : index
    %c0_94 = arith.constant 0 : index
    %c0_95 = arith.constant 0 : index
    %189 = vector.load %arg2[%c11_93, %c0_94, %c0_95] : memref<24x128x128xf32, #tpu.memory_space<vmem>>, vector<1x128x128xf32>
    %190 = vector.shape_cast %189 : vector<1x128x128xf32> to vector<128x128xf32>
    %cst_96 = arith.constant dense<0.000000e+00> : vector<16x128xf32>
    %191 = tpu.matmul %188, %190, %cst_96 {dimension_numbers = #tpu.dot_dimension_numbers<[1], [0], [0], [1], [0, 0, 1, 1], [], []>} : vector<16x128xf32>, vector<128x128xf32>, vector<16x128xf32> -> vector<16x128xf32>
    %c16 = arith.constant 16 : index
    %c0_97 = arith.constant 0 : index
    %192 = vector.load %arg3[%c16, %c0_97] : memref<40x128xf32, #tpu.memory_space<vmem>>, vector<1x128xf32>
    %193 = vector.shape_cast %192 : vector<1x128xf32> to vector<128xf32>
    %194 = vector.shape_cast %193 : vector<128xf32> to vector<1x128xf32>
    %195 = vector.broadcast %194 : vector<1x128xf32> to vector<16x128xf32>
    %196 = arith.addf %191, %195 : vector<16x128xf32>
    %cst_98 = arith.constant 0.000000e+00 : f32
    %197 = vector.broadcast %cst_98 : f32 to vector<16x128xf32>
    %198 = arith.maximumf %196, %197 : vector<16x128xf32>
    %c12_99 = arith.constant 12 : index
    %c0_100 = arith.constant 0 : index
    %c0_101 = arith.constant 0 : index
    %199 = vector.load %arg2[%c12_99, %c0_100, %c0_101] : memref<24x128x128xf32, #tpu.memory_space<vmem>>, vector<1x128x128xf32>
    %200 = vector.shape_cast %199 : vector<1x128x128xf32> to vector<128x128xf32>
    %cst_102 = arith.constant dense<0.000000e+00> : vector<16x128xf32>
    %201 = tpu.matmul %198, %200, %cst_102 {dimension_numbers = #tpu.dot_dimension_numbers<[1], [0], [0], [1], [0, 0, 1, 1], [], []>} : vector<16x128xf32>, vector<128x128xf32>, vector<16x128xf32> -> vector<16x128xf32>
    %c17 = arith.constant 17 : index
    %c0_103 = arith.constant 0 : index
    %202 = vector.load %arg3[%c17, %c0_103] : memref<40x128xf32, #tpu.memory_space<vmem>>, vector<1x128xf32>
    %203 = vector.shape_cast %202 : vector<1x128xf32> to vector<128xf32>
    %204 = vector.shape_cast %203 : vector<128xf32> to vector<1x128xf32>
    %205 = vector.broadcast %204 : vector<1x128xf32> to vector<16x128xf32>
    %206 = arith.addf %201, %205 : vector<16x128xf32>
    %cst_104 = arith.constant 0.000000e+00 : f32
    %207 = vector.broadcast %cst_104 : f32 to vector<16x128xf32>
    %208 = arith.cmpf ogt, %206, %207 : vector<16x128xf32>
    %cst_105 = arith.constant 0.000000e+00 : f32
    %209 = vector.broadcast %cst_105 : f32 to vector<16x128xf32>
    %210 = arith.minimumf %206, %209 : vector<16x128xf32>
    %211 = math.exp %210 : vector<16x128xf32>
    %cst_106 = arith.constant 1.000000e+00 : f32
    %212 = vector.broadcast %cst_106 : f32 to vector<16x128xf32>
    %213 = arith.subf %211, %212 : vector<16x128xf32>
    %214 = arith.select %208, %206, %213 : vector<16x128xi1>, vector<16x128xf32>
    %c13_107 = arith.constant 13 : index
    %c0_108 = arith.constant 0 : index
    %c0_109 = arith.constant 0 : index
    %215 = vector.load %arg2[%c13_107, %c0_108, %c0_109] : memref<24x128x128xf32, #tpu.memory_space<vmem>>, vector<1x128x128xf32>
    %216 = vector.shape_cast %215 : vector<1x128x128xf32> to vector<128x128xf32>
    %cst_110 = arith.constant dense<0.000000e+00> : vector<16x128xf32>
    %217 = tpu.matmul %214, %216, %cst_110 {dimension_numbers = #tpu.dot_dimension_numbers<[1], [0], [0], [1], [0, 0, 1, 1], [], []>} : vector<16x128xf32>, vector<128x128xf32>, vector<16x128xf32> -> vector<16x128xf32>
    %c18 = arith.constant 18 : index
    %c0_111 = arith.constant 0 : index
    %218 = vector.load %arg3[%c18, %c0_111] : memref<40x128xf32, #tpu.memory_space<vmem>>, vector<1x128xf32>
    %219 = vector.shape_cast %218 : vector<1x128xf32> to vector<128xf32>
    %220 = vector.shape_cast %219 : vector<128xf32> to vector<1x128xf32>
    %221 = vector.broadcast %220 : vector<1x128xf32> to vector<16x128xf32>
    %222 = arith.addf %217, %221 : vector<16x128xf32>
    %cst_112 = arith.constant 0.000000e+00 : f32
    %223 = vector.broadcast %cst_112 : f32 to vector<16x128xf32>
    %224 = arith.cmpf ogt, %222, %223 : vector<16x128xf32>
    %cst_113 = arith.constant 0.000000e+00 : f32
    %225 = vector.broadcast %cst_113 : f32 to vector<16x128xf32>
    %226 = arith.minimumf %222, %225 : vector<16x128xf32>
    %227 = math.exp %226 : vector<16x128xf32>
    %cst_114 = arith.constant 1.000000e+00 : f32
    %228 = vector.broadcast %cst_114 : f32 to vector<16x128xf32>
    %229 = arith.subf %227, %228 : vector<16x128xf32>
    %230 = arith.select %224, %222, %229 : vector<16x128xi1>, vector<16x128xf32>
    %c19 = arith.constant 19 : index
    %c0_115 = arith.constant 0 : index
    %231 = vector.load %arg3[%c19, %c0_115] : memref<40x128xf32, #tpu.memory_space<vmem>>, vector<1x128xf32>
    %232 = vector.shape_cast %231 : vector<1x128xf32> to vector<128xf32>
    %233 = vector.shape_cast %232 : vector<128xf32> to vector<1x128xf32>
    %234 = vector.broadcast %233 : vector<1x128xf32> to vector<16x128xf32>
    %235 = arith.mulf %230, %234 : vector<16x128xf32>
    %c20 = arith.constant 20 : index
    %c0_116 = arith.constant 0 : index
    %236 = vector.load %arg3[%c20, %c0_116] : memref<40x128xf32, #tpu.memory_space<vmem>>, vector<1x128xf32>
    %237 = vector.shape_cast %236 : vector<1x128xf32> to vector<128xf32>
    %238 = vector.shape_cast %237 : vector<128xf32> to vector<1x128xf32>
    %239 = vector.broadcast %238 : vector<1x128xf32> to vector<16x128xf32>
    %240 = arith.addf %235, %239 : vector<16x128xf32>
    %cst_117 = arith.constant dense<0.000000e+00> : vector<16x128xf32>
    %241 = tpu.matmul %1, %240, %cst_117 {dimension_numbers = #tpu.dot_dimension_numbers<[0], [0], [1], [1], [0, 1, 1, 1], [], []>} : vector<16x16xf32>, vector<16x128xf32>, vector<16x128xf32> -> vector<16x128xf32>
    %cst_118 = arith.constant dense<0.000000e+00> : vector<16x128xf32>
    %242 = tpu.matmul %1, %240, %cst_118 {dimension_numbers = #tpu.dot_dimension_numbers<[1], [0], [0], [1], [0, 0, 1, 1], [], []>} : vector<16x16xf32>, vector<16x128xf32>, vector<16x128xf32> -> vector<16x128xf32>
    %c14_119 = arith.constant 14 : index
    %c0_120 = arith.constant 0 : index
    %c0_121 = arith.constant 0 : index
    %243 = vector.load %arg2[%c14_119, %c0_120, %c0_121] : memref<24x128x128xf32, #tpu.memory_space<vmem>>, vector<1x128x128xf32>
    %244 = vector.shape_cast %243 : vector<1x128x128xf32> to vector<128x128xf32>
    %cst_122 = arith.constant dense<0.000000e+00> : vector<16x128xf32>
    %245 = tpu.matmul %241, %244, %cst_122 {dimension_numbers = #tpu.dot_dimension_numbers<[1], [0], [0], [1], [0, 0, 1, 1], [], []>} : vector<16x128xf32>, vector<128x128xf32>, vector<16x128xf32> -> vector<16x128xf32>
    %c15_123 = arith.constant 15 : index
    %c0_124 = arith.constant 0 : index
    %c0_125 = arith.constant 0 : index
    %246 = vector.load %arg2[%c15_123, %c0_124, %c0_125] : memref<24x128x128xf32, #tpu.memory_space<vmem>>, vector<1x128x128xf32>
    %247 = vector.shape_cast %246 : vector<1x128x128xf32> to vector<128x128xf32>
    %cst_126 = arith.constant dense<0.000000e+00> : vector<16x128xf32>
    %248 = tpu.matmul %242, %247, %cst_126 {dimension_numbers = #tpu.dot_dimension_numbers<[1], [0], [0], [1], [0, 0, 1, 1], [], []>} : vector<16x128xf32>, vector<128x128xf32>, vector<16x128xf32> -> vector<16x128xf32>
    %249 = arith.addf %245, %248 : vector<16x128xf32>
    %c21 = arith.constant 21 : index
    %c0_127 = arith.constant 0 : index
    %250 = vector.load %arg3[%c21, %c0_127] : memref<40x128xf32, #tpu.memory_space<vmem>>, vector<1x128xf32>
    %251 = vector.shape_cast %250 : vector<1x128xf32> to vector<128xf32>
    %252 = vector.shape_cast %251 : vector<128xf32> to vector<1x128xf32>
    %253 = vector.broadcast %252 : vector<1x128xf32> to vector<16x128xf32>
    %254 = arith.addf %249, %253 : vector<16x128xf32>
    %cst_128 = arith.constant 0.000000e+00 : f32
    %255 = vector.broadcast %cst_128 : f32 to vector<16x128xf32>
    %256 = arith.cmpf ogt, %254, %255 : vector<16x128xf32>
    %cst_129 = arith.constant 0.000000e+00 : f32
    %257 = vector.broadcast %cst_129 : f32 to vector<16x128xf32>
    %258 = arith.minimumf %254, %257 : vector<16x128xf32>
    %259 = math.exp %258 : vector<16x128xf32>
    %cst_130 = arith.constant 1.000000e+00 : f32
    %260 = vector.broadcast %cst_130 : f32 to vector<16x128xf32>
    %261 = arith.subf %259, %260 : vector<16x128xf32>
    %262 = arith.select %256, %254, %261 : vector<16x128xi1>, vector<16x128xf32>
    %c16_131 = arith.constant 16 : index
    %c0_132 = arith.constant 0 : index
    %c0_133 = arith.constant 0 : index
    %263 = vector.load %arg2[%c16_131, %c0_132, %c0_133] : memref<24x128x128xf32, #tpu.memory_space<vmem>>, vector<1x128x128xf32>
    %264 = vector.shape_cast %263 : vector<1x128x128xf32> to vector<128x128xf32>
    %cst_134 = arith.constant dense<0.000000e+00> : vector<16x128xf32>
    %265 = tpu.matmul %262, %264, %cst_134 {dimension_numbers = #tpu.dot_dimension_numbers<[1], [0], [0], [1], [0, 0, 1, 1], [], []>} : vector<16x128xf32>, vector<128x128xf32>, vector<16x128xf32> -> vector<16x128xf32>
    %c22 = arith.constant 22 : index
    %c0_135 = arith.constant 0 : index
    %266 = vector.load %arg3[%c22, %c0_135] : memref<40x128xf32, #tpu.memory_space<vmem>>, vector<1x128xf32>
    %267 = vector.shape_cast %266 : vector<1x128xf32> to vector<128xf32>
    %268 = vector.shape_cast %267 : vector<128xf32> to vector<1x128xf32>
    %269 = vector.broadcast %268 : vector<1x128xf32> to vector<16x128xf32>
    %270 = arith.addf %265, %269 : vector<16x128xf32>
    %cst_136 = arith.constant 0.000000e+00 : f32
    %271 = vector.broadcast %cst_136 : f32 to vector<16x128xf32>
    %272 = arith.cmpf ogt, %270, %271 : vector<16x128xf32>
    %cst_137 = arith.constant 0.000000e+00 : f32
    %273 = vector.broadcast %cst_137 : f32 to vector<16x128xf32>
    %274 = arith.minimumf %270, %273 : vector<16x128xf32>
    %275 = math.exp %274 : vector<16x128xf32>
    %cst_138 = arith.constant 1.000000e+00 : f32
    %276 = vector.broadcast %cst_138 : f32 to vector<16x128xf32>
    %277 = arith.subf %275, %276 : vector<16x128xf32>
    %278 = arith.select %272, %270, %277 : vector<16x128xi1>, vector<16x128xf32>
    %c23 = arith.constant 23 : index
    %c0_139 = arith.constant 0 : index
    %279 = vector.load %arg3[%c23, %c0_139] : memref<40x128xf32, #tpu.memory_space<vmem>>, vector<1x128xf32>
    %280 = vector.shape_cast %279 : vector<1x128xf32> to vector<128xf32>
    %281 = vector.shape_cast %280 : vector<128xf32> to vector<1x128xf32>
    %282 = vector.broadcast %281 : vector<1x128xf32> to vector<16x128xf32>
    %283 = arith.mulf %278, %282 : vector<16x128xf32>
    %c24 = arith.constant 24 : index
    %c0_140 = arith.constant 0 : index
    %284 = vector.load %arg3[%c24, %c0_140] : memref<40x128xf32, #tpu.memory_space<vmem>>, vector<1x128xf32>
    %285 = vector.shape_cast %284 : vector<1x128xf32> to vector<128xf32>
    %286 = vector.shape_cast %285 : vector<128xf32> to vector<1x128xf32>
    %287 = vector.broadcast %286 : vector<1x128xf32> to vector<16x128xf32>
    %288 = arith.addf %283, %287 : vector<16x128xf32>
    %cst_141 = arith.constant dense<0.000000e+00> : vector<16x128xf32>
    %289 = tpu.matmul %1, %288, %cst_141 {dimension_numbers = #tpu.dot_dimension_numbers<[0], [0], [1], [1], [0, 1, 1, 1], [], []>} : vector<16x16xf32>, vector<16x128xf32>, vector<16x128xf32> -> vector<16x128xf32>
    %cst_142 = arith.constant 6.250000e-02 : f32
    %290 = vector.broadcast %cst_142 : f32 to vector<16x128xf32>
    %291 = arith.mulf %289, %290 : vector<16x128xf32>
    %c17_143 = arith.constant 17 : index
    %c0_144 = arith.constant 0 : index
    %c0_145 = arith.constant 0 : index
    %292 = vector.load %arg2[%c17_143, %c0_144, %c0_145] : memref<24x128x128xf32, #tpu.memory_space<vmem>>, vector<1x128x128xf32>
    %293 = vector.shape_cast %292 : vector<1x128x128xf32> to vector<128x128xf32>
    %cst_146 = arith.constant dense<0.000000e+00> : vector<16x128xf32>
    %294 = tpu.matmul %291, %293, %cst_146 {dimension_numbers = #tpu.dot_dimension_numbers<[1], [0], [0], [1], [0, 0, 1, 1], [], []>} : vector<16x128xf32>, vector<128x128xf32>, vector<16x128xf32> -> vector<16x128xf32>
    %c25 = arith.constant 25 : index
    %c0_147 = arith.constant 0 : index
    %295 = vector.load %arg3[%c25, %c0_147] : memref<40x128xf32, #tpu.memory_space<vmem>>, vector<1x128xf32>
    %296 = vector.shape_cast %295 : vector<1x128xf32> to vector<128xf32>
    %297 = vector.shape_cast %296 : vector<128xf32> to vector<1x128xf32>
    %298 = vector.broadcast %297 : vector<1x128xf32> to vector<16x128xf32>
    %299 = arith.addf %294, %298 : vector<16x128xf32>
    %cst_148 = arith.constant 0.000000e+00 : f32
    %300 = vector.broadcast %cst_148 : f32 to vector<16x128xf32>
    %301 = arith.cmpf ogt, %299, %300 : vector<16x128xf32>
    %cst_149 = arith.constant 0.000000e+00 : f32
    %302 = vector.broadcast %cst_149 : f32 to vector<16x128xf32>
    %303 = arith.minimumf %299, %302 : vector<16x128xf32>
    %304 = math.exp %303 : vector<16x128xf32>
    %cst_150 = arith.constant 1.000000e+00 : f32
    %305 = vector.broadcast %cst_150 : f32 to vector<16x128xf32>
    %306 = arith.subf %304, %305 : vector<16x128xf32>
    %307 = arith.select %301, %299, %306 : vector<16x128xi1>, vector<16x128xf32>
    %c18_151 = arith.constant 18 : index
    %c0_152 = arith.constant 0 : index
    %c0_153 = arith.constant 0 : index
    %308 = vector.load %arg2[%c18_151, %c0_152, %c0_153] : memref<24x128x128xf32, #tpu.memory_space<vmem>>, vector<1x128x128xf32>
    %309 = vector.shape_cast %308 : vector<1x128x128xf32> to vector<128x128xf32>
    %cst_154 = arith.constant dense<0.000000e+00> : vector<16x128xf32>
    %310 = tpu.matmul %307, %309, %cst_154 {dimension_numbers = #tpu.dot_dimension_numbers<[1], [0], [0], [1], [0, 0, 1, 1], [], []>} : vector<16x128xf32>, vector<128x128xf32>, vector<16x128xf32> -> vector<16x128xf32>
    %c26 = arith.constant 26 : index
    %c0_155 = arith.constant 0 : index
    %311 = vector.load %arg3[%c26, %c0_155] : memref<40x128xf32, #tpu.memory_space<vmem>>, vector<1x128xf32>
    %312 = vector.shape_cast %311 : vector<1x128xf32> to vector<128xf32>
    %313 = vector.shape_cast %312 : vector<128xf32> to vector<1x128xf32>
    %314 = vector.broadcast %313 : vector<1x128xf32> to vector<16x128xf32>
    %315 = arith.addf %310, %314 : vector<16x128xf32>
    %cst_156 = arith.constant 0.000000e+00 : f32
    %316 = vector.broadcast %cst_156 : f32 to vector<16x128xf32>
    %317 = arith.cmpf ogt, %315, %316 : vector<16x128xf32>
    %cst_157 = arith.constant 0.000000e+00 : f32
    %318 = vector.broadcast %cst_157 : f32 to vector<16x128xf32>
    %319 = arith.minimumf %315, %318 : vector<16x128xf32>
    %320 = math.exp %319 : vector<16x128xf32>
    %cst_158 = arith.constant 1.000000e+00 : f32
    %321 = vector.broadcast %cst_158 : f32 to vector<16x128xf32>
    %322 = arith.subf %320, %321 : vector<16x128xf32>
    %323 = arith.select %317, %315, %322 : vector<16x128xi1>, vector<16x128xf32>
    %c27 = arith.constant 27 : index
    %c0_159 = arith.constant 0 : index
    %324 = vector.load %arg3[%c27, %c0_159] : memref<40x128xf32, #tpu.memory_space<vmem>>, vector<1x128xf32>
    %325 = vector.shape_cast %324 : vector<1x128xf32> to vector<128xf32>
    %326 = vector.shape_cast %325 : vector<128xf32> to vector<1x128xf32>
    %327 = vector.broadcast %326 : vector<1x128xf32> to vector<16x128xf32>
    %328 = arith.mulf %323, %327 : vector<16x128xf32>
    %c28 = arith.constant 28 : index
    %c0_160 = arith.constant 0 : index
    %329 = vector.load %arg3[%c28, %c0_160] : memref<40x128xf32, #tpu.memory_space<vmem>>, vector<1x128xf32>
    %330 = vector.shape_cast %329 : vector<1x128xf32> to vector<128xf32>
    %331 = vector.shape_cast %330 : vector<128xf32> to vector<1x128xf32>
    %332 = vector.broadcast %331 : vector<1x128xf32> to vector<16x128xf32>
    %333 = arith.addf %328, %332 : vector<16x128xf32>
    %cst_161 = arith.constant dense<0.000000e+00> : vector<16x128xf32>
    %334 = tpu.matmul %1, %333, %cst_161 {dimension_numbers = #tpu.dot_dimension_numbers<[0], [0], [1], [1], [0, 1, 1, 1], [], []>} : vector<16x16xf32>, vector<16x128xf32>, vector<16x128xf32> -> vector<16x128xf32>
    %cst_162 = arith.constant dense<0.000000e+00> : vector<16x128xf32>
    %335 = tpu.matmul %1, %333, %cst_162 {dimension_numbers = #tpu.dot_dimension_numbers<[1], [0], [0], [1], [0, 0, 1, 1], [], []>} : vector<16x16xf32>, vector<16x128xf32>, vector<16x128xf32> -> vector<16x128xf32>
    %c19_163 = arith.constant 19 : index
    %c0_164 = arith.constant 0 : index
    %c0_165 = arith.constant 0 : index
    %336 = vector.load %arg2[%c19_163, %c0_164, %c0_165] : memref<24x128x128xf32, #tpu.memory_space<vmem>>, vector<1x128x128xf32>
    %337 = vector.shape_cast %336 : vector<1x128x128xf32> to vector<128x128xf32>
    %cst_166 = arith.constant dense<0.000000e+00> : vector<16x128xf32>
    %338 = tpu.matmul %334, %337, %cst_166 {dimension_numbers = #tpu.dot_dimension_numbers<[1], [0], [0], [1], [0, 0, 1, 1], [], []>} : vector<16x128xf32>, vector<128x128xf32>, vector<16x128xf32> -> vector<16x128xf32>
    %c20_167 = arith.constant 20 : index
    %c0_168 = arith.constant 0 : index
    %c0_169 = arith.constant 0 : index
    %339 = vector.load %arg2[%c20_167, %c0_168, %c0_169] : memref<24x128x128xf32, #tpu.memory_space<vmem>>, vector<1x128x128xf32>
    %340 = vector.shape_cast %339 : vector<1x128x128xf32> to vector<128x128xf32>
    %cst_170 = arith.constant dense<0.000000e+00> : vector<16x128xf32>
    %341 = tpu.matmul %335, %340, %cst_170 {dimension_numbers = #tpu.dot_dimension_numbers<[1], [0], [0], [1], [0, 0, 1, 1], [], []>} : vector<16x128xf32>, vector<128x128xf32>, vector<16x128xf32> -> vector<16x128xf32>
    %342 = arith.addf %338, %341 : vector<16x128xf32>
    %c21_171 = arith.constant 21 : index
    %c0_172 = arith.constant 0 : index
    %c0_173 = arith.constant 0 : index
    %343 = vector.load %arg2[%c21_171, %c0_172, %c0_173] : memref<24x128x128xf32, #tpu.memory_space<vmem>>, vector<1x128x128xf32>
    %344 = vector.shape_cast %343 : vector<1x128x128xf32> to vector<128x128xf32>
    %cst_174 = arith.constant dense<0.000000e+00> : vector<16x128xf32>
    %345 = tpu.matmul %288, %344, %cst_174 {dimension_numbers = #tpu.dot_dimension_numbers<[1], [0], [0], [1], [0, 0, 1, 1], [], []>} : vector<16x128xf32>, vector<128x128xf32>, vector<16x128xf32> -> vector<16x128xf32>
    %346 = arith.addf %342, %345 : vector<16x128xf32>
    %c29 = arith.constant 29 : index
    %c0_175 = arith.constant 0 : index
    %347 = vector.load %arg3[%c29, %c0_175] : memref<40x128xf32, #tpu.memory_space<vmem>>, vector<1x128xf32>
    %348 = vector.shape_cast %347 : vector<1x128xf32> to vector<128xf32>
    %349 = vector.shape_cast %348 : vector<128xf32> to vector<1x128xf32>
    %350 = vector.broadcast %349 : vector<1x128xf32> to vector<16x128xf32>
    %351 = arith.addf %346, %350 : vector<16x128xf32>
    %cst_176 = arith.constant 0.000000e+00 : f32
    %352 = vector.broadcast %cst_176 : f32 to vector<16x128xf32>
    %353 = arith.cmpf ogt, %351, %352 : vector<16x128xf32>
    %cst_177 = arith.constant 0.000000e+00 : f32
    %354 = vector.broadcast %cst_177 : f32 to vector<16x128xf32>
    %355 = arith.minimumf %351, %354 : vector<16x128xf32>
    %356 = math.exp %355 : vector<16x128xf32>
    %cst_178 = arith.constant 1.000000e+00 : f32
    %357 = vector.broadcast %cst_178 : f32 to vector<16x128xf32>
    %358 = arith.subf %356, %357 : vector<16x128xf32>
    %359 = arith.select %353, %351, %358 : vector<16x128xi1>, vector<16x128xf32>
    %c22_179 = arith.constant 22 : index
    %c0_180 = arith.constant 0 : index
    %c0_181 = arith.constant 0 : index
    %360 = vector.load %arg2[%c22_179, %c0_180, %c0_181] : memref<24x128x128xf32, #tpu.memory_space<vmem>>, vector<1x128x128xf32>
    %361 = vector.shape_cast %360 : vector<1x128x128xf32> to vector<128x128xf32>
    %cst_182 = arith.constant dense<0.000000e+00> : vector<16x128xf32>
    %362 = tpu.matmul %359, %361, %cst_182 {dimension_numbers = #tpu.dot_dimension_numbers<[1], [0], [0], [1], [0, 0, 1, 1], [], []>} : vector<16x128xf32>, vector<128x128xf32>, vector<16x128xf32> -> vector<16x128xf32>
    %c30 = arith.constant 30 : index
    %c0_183 = arith.constant 0 : index
    %363 = vector.load %arg3[%c30, %c0_183] : memref<40x128xf32, #tpu.memory_space<vmem>>, vector<1x128xf32>
    %364 = vector.shape_cast %363 : vector<1x128xf32> to vector<128xf32>
    %365 = vector.shape_cast %364 : vector<128xf32> to vector<1x128xf32>
    %366 = vector.broadcast %365 : vector<1x128xf32> to vector<16x128xf32>
    %367 = arith.addf %362, %366 : vector<16x128xf32>
    %cst_184 = arith.constant 0.000000e+00 : f32
    %368 = vector.broadcast %cst_184 : f32 to vector<16x128xf32>
    %369 = arith.cmpf ogt, %367, %368 : vector<16x128xf32>
    %cst_185 = arith.constant 0.000000e+00 : f32
    %370 = vector.broadcast %cst_185 : f32 to vector<16x128xf32>
    %371 = arith.minimumf %367, %370 : vector<16x128xf32>
    %372 = math.exp %371 : vector<16x128xf32>
    %cst_186 = arith.constant 1.000000e+00 : f32
    %373 = vector.broadcast %cst_186 : f32 to vector<16x128xf32>
    %374 = arith.subf %372, %373 : vector<16x128xf32>
    %375 = arith.select %369, %367, %374 : vector<16x128xi1>, vector<16x128xf32>
    %c31 = arith.constant 31 : index
    %c0_187 = arith.constant 0 : index
    %376 = vector.load %arg3[%c31, %c0_187] : memref<40x128xf32, #tpu.memory_space<vmem>>, vector<1x128xf32>
    %377 = vector.shape_cast %376 : vector<1x128xf32> to vector<128xf32>
    %378 = vector.shape_cast %377 : vector<128xf32> to vector<1x128xf32>
    %379 = vector.broadcast %378 : vector<1x128xf32> to vector<16x128xf32>
    %380 = arith.mulf %375, %379 : vector<16x128xf32>
    %c32 = arith.constant 32 : index
    %c0_188 = arith.constant 0 : index
    %381 = vector.load %arg3[%c32, %c0_188] : memref<40x128xf32, #tpu.memory_space<vmem>>, vector<1x128xf32>
    %382 = vector.shape_cast %381 : vector<1x128xf32> to vector<128xf32>
    %383 = vector.shape_cast %382 : vector<128xf32> to vector<1x128xf32>
    %384 = vector.broadcast %383 : vector<1x128xf32> to vector<16x128xf32>
    %385 = arith.addf %380, %384 : vector<16x128xf32>
    %c23_189 = arith.constant 23 : index
    %c0_190 = arith.constant 0 : index
    %c0_191 = arith.constant 0 : index
    %386 = vector.load %arg2[%c23_189, %c0_190, %c0_191] : memref<24x128x128xf32, #tpu.memory_space<vmem>>, vector<1x128x128xf32>
    %387 = vector.shape_cast %386 : vector<1x128x128xf32> to vector<128x128xf32>
    %cst_192 = arith.constant dense<0.000000e+00> : vector<16x128xf32>
    %388 = tpu.matmul %385, %387, %cst_192 {dimension_numbers = #tpu.dot_dimension_numbers<[1], [0], [0], [1], [0, 0, 1, 1], [], []>} : vector<16x128xf32>, vector<128x128xf32>, vector<16x128xf32> -> vector<16x128xf32>
    %c33 = arith.constant 33 : index
    %c0_193 = arith.constant 0 : index
    %389 = vector.load %arg3[%c33, %c0_193] : memref<40x128xf32, #tpu.memory_space<vmem>>, vector<1x128xf32>
    %390 = vector.shape_cast %389 : vector<1x128xf32> to vector<128xf32>
    %391 = vector.shape_cast %390 : vector<128xf32> to vector<1x128xf32>
    %392 = vector.broadcast %391 : vector<1x128xf32> to vector<16x128xf32>
    %393 = arith.addf %388, %392 : vector<16x128xf32>
    %394 = tpu.iota {dimensions = array<i32: 1>} : vector<16x128xi32>
    %c8_i32 = arith.constant 8 : i32
    %395 = vector.broadcast %c8_i32 : i32 to vector<16x128xi32>
    %396 = arith.cmpi slt, %394, %395 : vector<16x128xi32>
    %cst_194 = arith.constant -1.000000e+30 : f32
    %397 = vector.broadcast %cst_194 : f32 to vector<16x128xf32>
    %398 = arith.select %396, %393, %397 : vector<16x128xi1>, vector<16x128xf32>
    %cst_195 = arith.constant dense<0xFF800000> : vector<16xf32>
    %399 = vector.multi_reduction <maximumf>, %398, %cst_195 [1] : vector<16x128xf32> to vector<16xf32>
    %400 = vector.shape_cast %399 : vector<16xf32> to vector<16x1xf32>
    %401 = vector.broadcast %400 : vector<16x1xf32> to vector<16x128xf32>
    %402 = arith.subf %398, %401 : vector<16x128xf32>
    %403 = math.exp %402 : vector<16x128xf32>
    %cst_196 = arith.constant 0.000000e+00 : f32
    %404 = vector.broadcast %cst_196 : f32 to vector<16x128xf32>
    %405 = arith.select %396, %403, %404 : vector<16x128xi1>, vector<16x128xf32>
    %cst_197 = arith.constant dense<0.000000e+00> : vector<16xf32>
    %406 = vector.multi_reduction <add>, %405, %cst_197 [1] : vector<16x128xf32> to vector<16xf32>
    %407 = vector.shape_cast %406 : vector<16xf32> to vector<16x1xf32>
    %408 = math.log %407 : vector<16x1xf32>
    %409 = arith.addf %408, %400 : vector<16x1xf32>
    %410 = vector.broadcast %409 : vector<16x1xf32> to vector<16x128xf32>
    %411 = arith.subf %393, %410 : vector<16x128xf32>
    %cst_198 = arith.constant 0.000000e+00 : f32
    %412 = vector.broadcast %cst_198 : f32 to vector<16x128xf32>
    %413 = arith.select %396, %411, %412 : vector<16x128xi1>, vector<16x128xf32>
    %c0_199 = arith.constant 0 : index
    %c0_200 = arith.constant 0 : index
    %414 = vector.load %arg4[%c0_199, %c0_200] : memref<16x128xf32, #tpu.memory_space<vmem>>, vector<16x128xf32>
    tpu.vector_store %arg4[%c0_199, %c0_200], %413 {strides = array<i32>} : memref<16x128xf32, #tpu.memory_space<vmem>>, vector<16x128xf32>,
    return
  }
}

</mosaic_0001>

<bundles_post_ra>
// kernel: tpu_custom_call.1
= control target key start
LH: loop header
LB: loop body
LE: loop exit
PB: predicated region body
PF: predicated region fallthrough
CT: control target
= control target key end

     0   :  { %9 = vsyncpa [#allocation3], 0  ;;  %s2117_s0 = inlined_call_operand.hbm [shape: f32[16,128], index: 0, kind: input, shape index: {}]   ;;  %s2118_s1 = inlined_call_operand.hbm [shape: f32[16,16], index: 1, kind: input, shape index: {}]   ;;  %s2119_s2 = inlined_call_operand.hbm [shape: f32[24,128,128], index: 2, kind: input, shape index: {}]   ;;  %s2120_s3 = inlined_call_operand.hbm [shape: f32[40,128], index: 3, kind: input, shape index: {}]   ;;  %s2121_s4 = inlined_call_operand.hbm [shape: f32[16,128], index: 4, kind: output, shape index: {}]  }
   0x1   :  { %10 = vsyncpa [#allocation6], 0 }
   0x2   :  { %11 = vsyncpa [#allocation9], 0 }
   0x3   :  { %12 = vsyncpa [#allocation4], 0  ;;  %s30_s17 = sshll.u32 %s2118_s1, 4  ;;  %s1979_s18 = smov [#allocation5]   ;;  %s31_s17 = int_to_ptr.hbm [resolvable:$true] %s30_s17 }
   0x4   :  { %s32_s19 = sshll.u32 %s1979_s18, 4  ;;  %s17_s22 = sshll.u32 %s2117_s0, 4  ;;  %s33_s19 = int_to_ptr.vmem [resolvable:$true] %s32_s19  ;;  %s18_s22 = int_to_ptr.hbm [resolvable:$true] %s17_s22 }
   0x5   :  { %s1980_s23 = smov 128   ;;  %s1981_s24 = smov 8  }
   0x6   :  { %38 = dma.hbm_to_vmem [thread:$0]  %s31_s17, 256, %s33_s19, [#allocation6], %s1980_s23, %s1980_s23, %s1981_s24  }
   0x7   :  { %s1982_s25 = smov [#allocation2]   ;;  %s43_s1 = sshll.u32 %s2119_s2, 4  ;;  %s44_s1 = int_to_ptr.hbm [resolvable:$true] %s43_s1 }
   0x8   :  { %s19_s26 = sshll.u32 %s1982_s25, 4  ;;  %s56_s30 = sshll.u32 %s2120_s3, 4  ;;  %s20_s26 = int_to_ptr.vmem [resolvable:$true] %s19_s26  ;;  %s57_s30 = int_to_ptr.hbm [resolvable:$true] %s56_s30 }
   0x9   :  { %25 = dma.hbm_to_vmem [thread:$0]  %s18_s22, 256, %s20_s26, [#allocation3], %s1980_s23, %s1980_s23, %s1981_s24  }
   0xa   :  { %s1983_s5 = smov [#allocation7]   ;;  %s1984_s7 = smov [#allocation8]  }
   0xb   :  { %s45_s6 = sshll.u32 %s1983_s5, 4  ;;  %s58_s2 = sshll.u32 %s1984_s7, 4  ;;  %s46_s6 = int_to_ptr.vmem [resolvable:$true] %s45_s6  ;;  %s59_s2 = int_to_ptr.vmem [resolvable:$true] %s58_s2 }
   0xc   :  { %51 = dma.hbm_to_vmem [thread:$0]  %s44_s1, 49152, %s46_s6, [#allocation6], %s1980_s23, %s1980_s23, %s1981_s24  }
   0xd   :  { %64 = dma.hbm_to_vmem [thread:$0]  %s57_s30, 640, %s59_s2, [#allocation9], %s1980_s23, %s1980_s23, %s1981_s24  }
   0xe   :  { %1971 = dma.done.wait [#allocation3], 256  }
   0xf   :  { %1972 = vsyncadd [#allocation3], 4294967040 }
  0x10   :  { %1973 = dma.done.wait [#allocation6], 49408  }
  0x11   :  { %1974 = vsyncadd [#allocation6], 4294917888 }
  0x12   :  { %1975 = dma.done.wait [#allocation9], 640  }
  0x13   :  { %1976 = vsyncadd [#allocation9], 4294966656  ;;  %v100_v0 = vld [vmem:[#allocation7 + $0x78] sm:$0xff]  ;;  %v99_v1 = vld [vmem:[#allocation7 + $0x70] sm:$0xff]  ;;  %vm232_vm4 = vcmask 130048   ;;  %s1985_s3 = smov [#allocation10]  }
  0x14   :  { %103 = vmatpush.msra.mxu0 %v100_v0  ;;  %v98_v2 = vld [vmem:[#allocation7 + $0x68] sm:$0xff]  ;;  %v97_v3 = vld [vmem:[#allocation7 + $0x60] sm:$0xff]  ;;  %v96_v4 = vld [vmem:[#allocation7 + $0x58] sm:$0xff]  ;;  %s1666_s8 = sshll.u32 %s1985_s3, 4  ;;  %s1668_s11 = sshll.u32 %s2121_s4, 4  ;;  %s1667_s8 = int_to_ptr.vmem [resolvable:$true] %s1666_s8  ;;  %s1669_s11 = int_to_ptr.hbm [resolvable:$true] %s1668_s11 }
  0x15   :  { %v95_v5 = vld [vmem:[#allocation7 + $0x50] sm:$0xff]  ;;  %v154_v6 = vld [vmem:[#allocation7 + $0xf8] sm:$0xff]  ;;  %v94_v8 = vld [vmem:[#allocation7 + $0x48] sm:$0xff] }
  0x16   :  { %104 = vmatpush.msra.mxu0 %v99_v1  ;;  %v153_v7 = vld [vmem:[#allocation7 + $0xf0] sm:$0xff]  ;;  %157 = vmatpush.msra.mxu1 %v154_v6  ;;  %v93_v9 = vld [vmem:[#allocation7 + $0x40] sm:$0xff]  ;;  %v152_v10 = vld [vmem:[#allocation7 + $0xe8] sm:$0xff] }
  0x17   :  { %v151_v11 = vld [vmem:[#allocation7 + $0xe0] sm:$0xff]  ;;  %v92_v12 = vld [vmem:[#allocation7 + $0x38] sm:$0xff]  ;;  %v91_v14 = vld [vmem:[#allocation7 + $0x30] sm:$0xff] }
  0x18   :  { %105 = vmatpush.msra.mxu0 %v98_v2  ;;  %158 = vmatpush.msra.mxu1 %v153_v7  ;;  %v150_v13 = vld [vmem:[#allocation7 + $0xd8] sm:$0xff]  ;;  %v149_v15 = vld [vmem:[#allocation7 + $0xd0] sm:$0xff]  ;;  %v90_v16 = vld [vmem:[#allocation7 + $0x28] sm:$0xff] }
  0x19   :  { %v148_v17 = vld [vmem:[#allocation7 + $0xc8] sm:$0xff]  ;;  %v89_v18 = vld [vmem:[#allocation7 + $0x20] sm:$0xff]  ;;  %v88_v19 = vld [vmem:[#allocation7 + $0x18] sm:$0xff] }
  0x1a   :  { %106 = vmatpush.msra.mxu0 %v97_v3  ;;  %159 = vmatpush.msra.mxu1 %v152_v10  ;;  %v87_v20 = vld [vmem:[#allocation7 + $0x10] sm:$0xff]  ;;  %v86_v21 = vld [vmem:[#allocation7 + $0x8] sm:$0xff]  ;;  %v85_v22 = vld [vmem:[#allocation7] sm:$0xff] }
  0x1b   :  { %v81_v23 = vld [vmem:[#allocation2] sm:$0xff]  ;;  %v82_v24 = vld [vmem:[#allocation2 + $0x8] sm:$0xff]  ;;  %v146_v26 = vld [vmem:[#allocation7 + $0xb8] sm:$0xff] }
  0x1c   :  { %107 = vmatpush.msra.mxu0 %v96_v4  ;;  %160 = vmatpush.msra.mxu1 %v151_v11  ;;  %v147_v25 = vld [vmem:[#allocation7 + $0xc0] sm:$0xff]  ;;  %v145_v27 = vld [vmem:[#allocation7 + $0xb0] sm:$0xff]  ;;  %v144_v28 = vld [vmem:[#allocation7 + $0xa8] sm:$0xff] }
  0x1d   :  { %v143_v29 = vld [vmem:[#allocation7 + $0xa0] sm:$0xff]  ;;  %v2035_v30 = vld [vmem:[#allocation5] sm:$0xff]  ;;  %v142_v31 = vld [vmem:[#allocation7 + $0x98] sm:$0xff] }
  0x1e   :  { %108 = vmatpush.msra.mxu0 %v95_v5  ;;  %161 = vmatpush.msra.mxu1 %v150_v13  ;;  %v141_v32 = vld [vmem:[#allocation7 + $0x90] sm:$0xff]  ;;  %v140_v33 = vld [vmem:[#allocation7 + $0x88] sm:$0xff]  ;;  %v139_v34 = vld [vmem:[#allocation7 + $0x80] sm:$0xff] }
  0x1f   :  { %200 = vxpose.xlu0.b32.start [1/2] (short) (narrow) %v2035_v30, 16  ;;  %v2038_v35 = vld [vmem:[#allocation5 + $0x8] sm:$0xff]  ;;  %v1743_v36 = vld [vmem:[#allocation8] ss:$0 sm:$0xff]  ;;  %v1744_v51 = vld [vmem:[#allocation8 + $0x1] ss:$0 sm:$0xff] }
  0x20   :  { %109 = vmatpush.msra.mxu0 %v94_v8  ;;  %162 = vmatpush.msra.mxu1 %v149_v15  ;;  %v1745_v63 = vld [vmem:[#allocation8 + $0x2] ss:$0 sm:$0xff]  ;;  %v1746_v4 = vld [vmem:[#allocation8 + $0x3] ss:$0 sm:$0xff]  ;;  %v307_v10 = vld [vmem:[#allocation7 + $0x178] sm:$0xff] }
  0x21   :  { %v323_v11 = vld [vmem:[#allocation7 + $0x1f0] sm:$0xff]  ;;  %v322_v13 = vld [vmem:[#allocation7 + $0x1e8] sm:$0xff]  ;;  %v321_v15 = vld [vmem:[#allocation7 + $0x1e0] sm:$0xff] }
  0x22   :  { %110 = vmatpush.msra.mxu0 %v93_v9  ;;  %163 = vmatpush.msra.mxu1 %v148_v17  ;;  %v324_v9 = vld [vmem:[#allocation7 + $0x1f8] sm:$0xff] }
  0x24   :  { %111 = vmatpush.msra.mxu0 %v92_v12  ;;  %164 = vmatpush.msra.mxu1 %v147_v25  ;;  %v306_v12 = vld [vmem:[#allocation7 + $0x170] sm:$0xff]  ;;  %v300_v25 = vld [vmem:[#allocation7 + $0x140] sm:$0xff] }
  0x26   :  { %112 = vmatpush.msra.mxu0 %v91_v14  ;;  %165 = vmatpush.msra.mxu1 %v146_v26  ;;  %v305_v14 = vld [vmem:[#allocation7 + $0x168] sm:$0xff]  ;;  %v316_v26 = vld [vmem:[#allocation7 + $0x1b8] sm:$0xff] }
  0x27   :  { %201 = vxpose.xlu0.b32.end [2/2] (short) (narrow) %v2038_v35, 16 }
  0x28   :  { %113 = vmatpush.msra.mxu0 %v90_v16  ;;  %166 = vmatpush.msra.mxu1 %v145_v27  ;;  %v304_v16 = vld [vmem:[#allocation7 + $0x160] sm:$0xff]  ;;  %v299_v27 = vld [vmem:[#allocation7 + $0x138] sm:$0xff] }
  0x2a   :  { %114 = vmatpush.msra.mxu0 %v89_v18  ;;  %167 = vmatpush.msra.mxu1 %v144_v28  ;;  %v320_v18 = vld [vmem:[#allocation7 + $0x1d8] sm:$0xff]  ;;  %v315_v28 = vld [vmem:[#allocation7 + $0x1b0] sm:$0xff] }
  0x2c   :  { %115 = vmatpush.msra.mxu0 %v88_v19  ;;  %168 = vmatpush.msra.mxu1 %v143_v29  ;;  %v303_v19 = vld [vmem:[#allocation7 + $0x158] sm:$0xff]  ;;  %v298_v29 = vld [vmem:[#allocation7 + $0x130] sm:$0xff] }
  0x2e   :  { %116 = vmatpush.msra.mxu0 %v87_v20  ;;  %169 = vmatpush.msra.mxu1 %v142_v31  ;;  %v319_v20 = vld [vmem:[#allocation7 + $0x1d0] sm:$0xff]  ;;  %v314_v31 = vld [vmem:[#allocation7 + $0x1a8] sm:$0xff] }
  0x30   :  { %117 = vmatpush.msra.mxu0 %v86_v21  ;;  %170 = vmatpush.msra.mxu1 %v141_v32  ;;  %v302_v21 = vld [vmem:[#allocation7 + $0x150] sm:$0xff]  ;;  %v297_v32 = vld [vmem:[#allocation7 + $0x128] sm:$0xff] }
  0x32   :  { %118 = vmatpush.msra.mxu0 %v85_v22  ;;  %171 = vmatpush.msra.mxu1 %v140_v33  ;;  %v318_v22 = vld [vmem:[#allocation7 + $0x1c8] sm:$0xff]  ;;  %v313_v33 = vld [vmem:[#allocation7 + $0x1a0] sm:$0xff] }
  0x33   :  { %119 = vmatmul.f32.vlgmr.msra.gmra.mxu0 %v81_v23  ;;  %v301_v23 = vld [vmem:[#allocation7 + $0x148] sm:$0xff] }
  0x34   :  { %172 = vmatpush.msra.mxu1 %v139_v34  ;;  %v296_v34 = vld [vmem:[#allocation7 + $0x120] sm:$0xff] }
  0x3b   :  { %122 = vmatmul.f32.gmra.mxu0 %v82_v24  ;;  %v317_v24 = vld [vmem:[#allocation7 + $0x1c0] sm:$0xff] }
  0xb0   :  { %v120_v37 = vpop.f32.mrf.mxu0 }
  0xb1   :  { %v121_v38 = vadd.f32 %v1743_v36, %v120_v37  ;;  %v295_v37 = vld [vmem:[#allocation7 + $0x118] sm:$0xff] }
  0xb3   :  { %v128_v39 = vmin.f32 %v121_v38, 0.0  ;;  %vm126_vm0 = vcmp.gt.f32.partialorder %v121_v38, 0.0 }
  0xb5   :  { %v130_v40 = vmul.f32 1.442695, %v128_v39  ;;  %v294_v39 = vld [vmem:[#allocation7 + $0x110] sm:$0xff] }
  0xb7   :  { %1777 = vpow2.f32 %v130_v40  ;;  %v310_v40 = vld [vmem:[#allocation7 + $0x188] sm:$0xff] }
  0xb8   :  { %v123_v41 = vpop.f32.mrf.mxu0 }
  0xb9   :  { %v124_v42 = vadd.f32 %v1743_v36, %v123_v41  ;;  %v312_v36 = vld [vmem:[#allocation7 + $0x198] sm:$0xff]  ;;  %v293_v41 = vld [vmem:[#allocation7 + $0x108] sm:$0xff] }
  0xbb   :  { %v129_v43 = vmin.f32 %v124_v42, 0.0  ;;  %vm127_vm1 = vcmp.gt.f32.partialorder %v124_v42, 0.0 }
  0xbd   :  { %v1778_v44 = vpop.eup %1777  ;;  %v132_v45 = vmul.f32 1.442695, %v129_v43  ;;  %v292_v43 = vld [vmem:[#allocation7 + $0x100] sm:$0xff] }
  0xbe   :  { %v1683_v46 = vadd.f32 -1.0, %v1778_v44  ;;  %v403_v44 = vld [vmem:[#allocation7 + $0x278] sm:$0xff] }
  0xbf   :  { %1779 = vpow2.f32 %v132_v45  ;;  %v402_v45 = vld [vmem:[#allocation7 + $0x270] sm:$0xff]  ;;  %406 = vmatpush.msrb.mxu0 %v403_v44 }
  0xc0   :  { %v136_v47 = vsel %vm126_vm0, %v121_v38, %v1683_v46  ;;  %v311_v38 = vld [vmem:[#allocation7 + $0x190] sm:$0xff]  ;;  %v401_v46 = vld [vmem:[#allocation7 + $0x268] sm:$0xff] }
  0xc1   :  { %173 = vmatmul.f32.vlgmr.msra.gmra.mxu1 %v136_v47  ;;  %407 = vmatpush.msrb.mxu0 %v402_v45  ;;  %v400_v47 = vld [vmem:[#allocation7 + $0x260] sm:$0xff] }
  0xc3   :  { %v2041_v7 = vpop.trf.xlu0  ;;  %408 = vmatpush.msrb.mxu0 %v401_v46  ;;  %v482_v46 = vld [vmem:[#allocation7 + $0x2b8] sm:$0xff] }
  0xc5   :  { %v1780_v48 = vpop.eup %1779  ;;  %409 = vmatpush.msrb.mxu0 %v400_v47 }
  0xc6   :  { %v1684_v49 = vadd.f32 -1.0, %v1780_v48  ;;  %v399_v48 = vld [vmem:[#allocation7 + $0x258] sm:$0xff] }
  0xc7   :  { %410 = vmatpush.msrb.mxu0 %v399_v48  ;;  %v481_v48 = vld [vmem:[#allocation7 + $0x2b0] sm:$0xff] }
  0xc8   :  { %v137_v50 = vsel %vm127_vm1, %v124_v42, %v1684_v49  ;;  %v309_v42 = vld [vmem:[#allocation7 + $0x180] sm:$0xff]  ;;  %v398_v49 = vld [vmem:[#allocation7 + $0x250] sm:$0xff] }
  0xc9   :  { %176 = vmatmul.f32.gmra.mxu1 %v137_v50  ;;  %411 = vmatpush.msrb.mxu0 %v398_v49 }
  0xcb   :  { %v2047_v17 = vpop.trf.xlu0 }
 0x13e   :  { %v174_v52 = vpop.f32.mrf.mxu1 }
 0x13f   :  { %v175_v53 = vadd.f32 %v1744_v51, %v174_v52 }
 0x141   :  { %v182_v54 = vmin.f32 %v175_v53, 0.0  ;;  %vm180_vm2 = vcmp.gt.f32.partialorder %v175_v53, 0.0 }
 0x143   :  { %v184_v55 = vmul.f32 1.442695, %v182_v54  ;;  %v397_v54 = vld [vmem:[#allocation7 + $0x248] sm:$0xff] }
 0x144   :  { %412 = vmatpush.msrb.mxu0 %v397_v54  ;;  %v479_v54 = vld [vmem:[#allocation7 + $0x2a0] sm:$0xff] }
 0x145   :  { %1781 = vpow2.f32 %v184_v55  ;;  %v396_v55 = vld [vmem:[#allocation7 + $0x240] sm:$0xff] }
 0x146   :  { %v177_v56 = vpop.f32.mrf.mxu1  ;;  %413 = vmatpush.msrb.mxu0 %v396_v55 }
 0x147   :  { %v178_v57 = vadd.f32 %v1744_v51, %v177_v56  ;;  %v395_v56 = vld [vmem:[#allocation7 + $0x238] sm:$0xff] }
 0x148   :  { %414 = vmatpush.msrb.mxu0 %v395_v56  ;;  %v478_v56 = vld [vmem:[#allocation7 + $0x298] sm:$0xff] }
 0x149   :  { %v183_v58 = vmin.f32 %v178_v57, 0.0  ;;  %vm181_vm3 = vcmp.gt.f32.partialorder %v178_v57, 0.0 }
 0x14b   :  { %v186_v59 = vmul.f32 1.442695, %v183_v58  ;;  %v1782_v60 = vpop.eup %1781  ;;  %v393_v58 = vld [vmem:[#allocation7 + $0x228] sm:$0xff] }
 0x14c   :  { %v1685_v61 = vadd.f32 -1.0, %v1782_v60  ;;  %v391_v60 = vld [vmem:[#allocation7 + $0x218] sm:$0xff] }
 0x14d   :  { %1783 = vpow2.f32 %v186_v59  ;;  %v392_v59 = vld [vmem:[#allocation7 + $0x220] sm:$0xff] }
 0x14e   :  { %v190_v1 = vsel %vm180_vm2, %v175_v53, %v1685_v61  ;;  %v390_v61 = vld [vmem:[#allocation7 + $0x210] sm:$0xff] }
 0x14f   :  { %v194_v5 = vmul.f32 %v1745_v63, %v190_v1 }
 0x151   :  { %v198_v8 = vadd.f32 %v1746_v4, %v194_v5 }
 0x153   :  { %v1784_v62 = vpop.eup %1783 }
 0x154   :  { %v1686_v0 = vadd.f32 -1.0, %v1784_v62  ;;  %v389_v62 = vld [vmem:[#allocation7 + $0x208] sm:$0xff] }
 0x156   :  { %v191_v2 = vsel %vm181_vm3, %v178_v57, %v1686_v0  ;;  %v394_v57 = vld [vmem:[#allocation7 + $0x230] sm:$0xff]  ;;  %v1747_v0 = vld [vmem:[#allocation8 + $0x4] ss:$0 sm:$0xff] }
 0x157   :  { %v195_v3 = vmul.f32 %v1745_v63, %v191_v2  ;;  %415 = vmatpush.msrb.mxu0 %v394_v57  ;;  %v388_v63 = vld [vmem:[#allocation7 + $0x200] sm:$0xff]  ;;  %v477_v57 = vld [vmem:[#allocation7 + $0x290] sm:$0xff] }
 0x159   :  { %v199_v6 = vadd.f32 %v1746_v4, %v195_v3  ;;  %416 = vmatpush.msrb.mxu0 %v393_v58  ;;  %v476_v58 = vld [vmem:[#allocation7 + $0x288] sm:$0xff] }
 0x15b   :  { %253 = vmatpush.msra.mxu2 %v199_v6  ;;  %282 = vmatpush.msra.mxu3 %v199_v6 }
 0x15c   :  { %417 = vmatpush.msrb.mxu0 %v392_v59  ;;  %v475_v59 = vld [vmem:[#allocation7 + $0x280] sm:$0xff] }
 0x15d   :  { %254 = vmatpush.msra.mxu2 %v198_v8  ;;  %283 = vmatpush.msra.mxu3 %v198_v8 }
 0x15e   :  { %1687 = vmatmul.msk.f32.vlgmr.msra.gmra.mxu2 %vm232_vm4, %v2041_v7  ;;  %1689 = vmatmul.msk.f32.vlgmr.msra.gmra.mxu3 %vm232_vm4, %v2035_v30 }
 0x15f   :  { %325 = vmatpush.msrb.mxu2 %v324_v9  ;;  %348 = vmatpush.msrb.mxu3 %v307_v10 }
 0x160   :  { %418 = vmatpush.msrb.mxu0 %v391_v60  ;;  %v544_v60 = vld [vmem:[#allocation7 + $0x378] sm:$0xff] }
 0x161   :  { %326 = vmatpush.msrb.mxu2 %v323_v11  ;;  %349 = vmatpush.msrb.mxu3 %v306_v12 }
 0x162   :  { %419 = vmatpush.msrb.mxu0 %v390_v61  ;;  %v543_v61 = vld [vmem:[#allocation7 + $0x370] sm:$0xff] }
 0x163   :  { %327 = vmatpush.msrb.mxu2 %v322_v13  ;;  %350 = vmatpush.msrb.mxu3 %v305_v14 }
 0x164   :  { %420 = vmatpush.msrb.mxu0 %v389_v62  ;;  %v542_v62 = vld [vmem:[#allocation7 + $0x368] sm:$0xff] }
 0x165   :  { %328 = vmatpush.msrb.mxu2 %v321_v15  ;;  %351 = vmatpush.msrb.mxu3 %v304_v16 }
 0x166   :  { %1688 = vmatmul.msk.f32.gmra.mxu2 %vm232_vm4, %v2047_v17  ;;  %1690 = vmatmul.msk.f32.gmra.mxu3 %vm232_vm4, %v2038_v35 }
 0x167   :  { %329 = vmatpush.msrb.mxu2 %v320_v18  ;;  %352 = vmatpush.msrb.mxu3 %v303_v19 }
 0x168   :  { %421 = vmatpush.msrb.mxu0 %v388_v63  ;;  %v541_v63 = vld [vmem:[#allocation7 + $0x360] sm:$0xff] }
 0x169   :  { %330 = vmatpush.msrb.mxu2 %v319_v20  ;;  %353 = vmatpush.msrb.mxu3 %v302_v21  ;;  %v1748_v21 = vld [vmem:[#allocation8 + $0x5] ss:$0 sm:$0xff] }
 0x16b   :  { %331 = vmatpush.msrb.mxu2 %v318_v22  ;;  %354 = vmatpush.msrb.mxu3 %v301_v23 }
 0x16d   :  { %332 = vmatpush.msrb.mxu2 %v317_v24  ;;  %355 = vmatpush.msrb.mxu3 %v300_v25 }
 0x16f   :  { %333 = vmatpush.msrb.mxu2 %v316_v26  ;;  %356 = vmatpush.msrb.mxu3 %v299_v27  ;;  %v490_v27 = vld [vmem:[#allocation7 + $0x2f8] sm:$0xff] }
 0x171   :  { %334 = vmatpush.msrb.mxu2 %v315_v28  ;;  %357 = vmatpush.msrb.mxu3 %v298_v29  ;;  %v489_v28 = vld [vmem:[#allocation7 + $0x2f0] sm:$0xff] }
 0x173   :  { %335 = vmatpush.msrb.mxu2 %v314_v31  ;;  %358 = vmatpush.msrb.mxu3 %v297_v32  ;;  %v488_v31 = vld [vmem:[#allocation7 + $0x2e8] sm:$0xff] }
 0x175   :  { %336 = vmatpush.msrb.mxu2 %v313_v33  ;;  %359 = vmatpush.msrb.mxu3 %v296_v34  ;;  %v487_v33 = vld [vmem:[#allocation7 + $0x2e0] sm:$0xff] }
 0x177   :  { %337 = vmatpush.msrb.mxu2 %v312_v36  ;;  %360 = vmatpush.msrb.mxu3 %v295_v37  ;;  %v486_v36 = vld [vmem:[#allocation7 + $0x2d8] sm:$0xff] }
 0x179   :  { %338 = vmatpush.msrb.mxu2 %v311_v38  ;;  %361 = vmatpush.msrb.mxu3 %v294_v39  ;;  %v485_v38 = vld [vmem:[#allocation7 + $0x2d0] sm:$0xff] }
 0x17b   :  { %339 = vmatpush.msrb.mxu2 %v310_v40  ;;  %362 = vmatpush.msrb.mxu3 %v293_v41  ;;  %v484_v40 = vld [vmem:[#allocation7 + $0x2c8] sm:$0xff]  ;;  %v483_v41 = vld [vmem:[#allocation7 + $0x2c0] sm:$0xff] }
 0x17d   :  { %340 = vmatpush.msrb.mxu2 %v309_v42  ;;  %363 = vmatpush.msrb.mxu3 %v292_v43  ;;  %v1749_v43 = vld [vmem:[#allocation8 + $0x6] ss:$0 sm:$0xff] }
 0x17f   :  { %493 = vmatpush.msra.mxu2 %v490_v27  ;;  %547 = vmatpush.msra.mxu3 %v544_v60  ;;  %v723_v27 = vld [vmem:[#allocation7 + $0x4b0] sm:$0xff] }
 0x180   :  { %v651_v60 = vld [vmem:[#allocation7 + $0x3f0] sm:$0xff] }
 0x181   :  { %494 = vmatpush.msra.mxu2 %v489_v28  ;;  %548 = vmatpush.msra.mxu3 %v543_v61  ;;  %v722_v28 = vld [vmem:[#allocation7 + $0x4a8] sm:$0xff] }
 0x183   :  { %495 = vmatpush.msra.mxu2 %v488_v31  ;;  %549 = vmatpush.msra.mxu3 %v542_v62  ;;  %v720_v31 = vld [vmem:[#allocation7 + $0x498] sm:$0xff]  ;;  %v650_v62 = vld [vmem:[#allocation7 + $0x3e8] sm:$0xff] }
 0x185   :  { %496 = vmatpush.msra.mxu2 %v487_v33  ;;  %550 = vmatpush.msra.mxu3 %v541_v63  ;;  %v718_v33 = vld [vmem:[#allocation7 + $0x488] sm:$0xff] }
 0x187   :  { %497 = vmatpush.msra.mxu2 %v486_v36  ;;  %v717_v36 = vld [vmem:[#allocation7 + $0x480] sm:$0xff] }
 0x189   :  { %498 = vmatpush.msra.mxu2 %v485_v38 }
 0x18b   :  { %499 = vmatpush.msra.mxu2 %v484_v40 }
 0x18d   :  { %500 = vmatpush.msra.mxu2 %v483_v41 }
 0x18f   :  { %501 = vmatpush.msra.mxu2 %v482_v46 }
 0x191   :  { %502 = vmatpush.msra.mxu2 %v481_v48 }
 0x1e1   :  { %v256_v50 = vpop.f32.mrf.mxu2  ;;  %v285_v51 = vpop.f32.mrf.mxu3 }
 0x1e2   :  { %341 = vmatmul.f32.vlgmr.msrb.gmra.mxu2 %v285_v51  ;;  %364 = vmatmul.f32.vlgmr.msrb.gmra.mxu3 %v256_v50  ;;  %v1750_v50 = vld [vmem:[#allocation8 + $0x7] ss:$0 sm:$0xff] }
 0x1e9   :  { %v259_v52 = vpop.f32.mrf.mxu2  ;;  %v288_v53 = vpop.f32.mrf.mxu3 }
 0x1ea   :  { %344 = vmatmul.f32.gmra.mxu2 %v288_v53  ;;  %367 = vmatmul.f32.gmra.mxu3 %v259_v52  ;;  %v480_v52 = vld [vmem:[#allocation7 + $0x2a8] sm:$0xff] }
 0x1eb   :  { %503 = vmatpush.msra.mxu2 %v480_v52 }
 0x1ed   :  { %504 = vmatpush.msra.mxu2 %v479_v54 }
 0x1ef   :  { %505 = vmatpush.msra.mxu2 %v478_v56 }
 0x1f1   :  { %506 = vmatpush.msra.mxu2 %v477_v57 }
 0x1f3   :  { %507 = vmatpush.msra.mxu2 %v476_v58 }
 0x1f5   :  { %508 = vmatpush.msra.mxu2 %v475_v59  ;;  %v652_v59 = vld [vmem:[#allocation7 + $0x3f8] sm:$0xff] }
 0x1f7   :  { %693 = vmatpush.msrb.mxu2 %v652_v59  ;;  %v779_v59 = vld [vmem:[#allocation7 + $0x520] sm:$0xff] }
 0x1f9   :  { %694 = vmatpush.msrb.mxu2 %v651_v60  ;;  %v778_v60 = vld [vmem:[#allocation7 + $0x518] sm:$0xff] }
 0x1fb   :  { %695 = vmatpush.msrb.mxu2 %v650_v62  ;;  %v776_v62 = vld [vmem:[#allocation7 + $0x508] sm:$0xff] }
 0x265   :  { %v342_v1 = vpop.f32.mrf.mxu2  ;;  %v365_v2 = vpop.f32.mrf.mxu3 }
 0x266   :  { %v366_v3 = vadd.f32 %v365_v2, %v342_v1  ;;  %v539_v1 = vld [vmem:[#allocation7 + $0x350] sm:$0xff]  ;;  %v538_v2 = vld [vmem:[#allocation7 + $0x348] sm:$0xff] }
 0x268   :  { %v373_v4 = vadd.f32 %v1747_v0, %v366_v3  ;;  %v537_v3 = vld [vmem:[#allocation7 + $0x340] sm:$0xff] }
 0x26a   :  { %v377_v5 = vmin.f32 %v373_v4, 0.0  ;;  %vm375_vm5 = vcmp.gt.f32.partialorder %v373_v4, 0.0 }
 0x26c   :  { %v379_v6 = vmul.f32 1.442695, %v377_v5  ;;  %v535_v5 = vld [vmem:[#allocation7 + $0x330] sm:$0xff] }
 0x26d   :  { %v345_v8 = vpop.f32.mrf.mxu2  ;;  %v368_v9 = vpop.f32.mrf.mxu3 }
 0x26e   :  { %v369_v10 = vadd.f32 %v368_v9, %v345_v8  ;;  %1785 = vpow2.f32 %v379_v6  ;;  %v534_v6 = vld [vmem:[#allocation7 + $0x328] sm:$0xff]  ;;  %v533_v8 = vld [vmem:[#allocation7 + $0x320] sm:$0xff] }
 0x270   :  { %v374_v11 = vadd.f32 %v1747_v0, %v369_v10  ;;  %v540_v0 = vld [vmem:[#allocation7 + $0x358] sm:$0xff] }
 0x271   :  { %551 = vmatpush.msra.mxu3 %v540_v0  ;;  %v649_v0 = vld [vmem:[#allocation7 + $0x3e0] sm:$0xff] }
 0x272   :  { %v378_v12 = vmin.f32 %v374_v11, 0.0  ;;  %vm376_vm6 = vcmp.gt.f32.partialorder %v374_v11, 0.0  ;;  %696 = vmatpush.msrb.mxu2 %v649_v0 }
 0x273   :  { %552 = vmatpush.msra.mxu3 %v539_v1 }
 0x274   :  { %v1786_v13 = vpop.eup %1785  ;;  %v381_v14 = vmul.f32 1.442695, %v378_v12  ;;  %v531_v12 = vld [vmem:[#allocation7 + $0x310] sm:$0xff] }
 0x275   :  { %v1691_v15 = vadd.f32 -1.0, %v1786_v13  ;;  %553 = vmatpush.msra.mxu3 %v538_v2  ;;  %v530_v13 = vld [vmem:[#allocation7 + $0x308] sm:$0xff] }
 0x276   :  { %1787 = vpow2.f32 %v381_v14 }
 0x277   :  { %v385_v16 = vsel %vm375_vm5, %v373_v4, %v1691_v15  ;;  %v536_v4 = vld [vmem:[#allocation7 + $0x338] sm:$0xff]  ;;  %554 = vmatpush.msra.mxu3 %v537_v3 }
 0x278   :  { %422 = vmatmul.f32.vlgmr.msrb.gmra.mxu0 %v385_v16  ;;  %v529_v16 = vld [vmem:[#allocation7 + $0x300] sm:$0xff] }
 0x279   :  { %555 = vmatpush.msra.mxu3 %v536_v4  ;;  %v646_v4 = vld [vmem:[#allocation7 + $0x3c8] sm:$0xff] }
 0x27b   :  { %556 = vmatpush.msra.mxu3 %v535_v5  ;;  %v645_v5 = vld [vmem:[#allocation7 + $0x3c0] sm:$0xff] }
 0x27c   :  { %v1788_v18 = vpop.eup %1787 }
 0x27d   :  { %v1692_v19 = vadd.f32 -1.0, %v1788_v18  ;;  %557 = vmatpush.msra.mxu3 %v534_v6  ;;  %v732_v18 = vld [vmem:[#allocation7 + $0x4f8] sm:$0xff] }
 0x27f   :  { %v386_v20 = vsel %vm376_vm6, %v374_v11, %v1692_v19  ;;  %v532_v11 = vld [vmem:[#allocation7 + $0x318] sm:$0xff]  ;;  %558 = vmatpush.msra.mxu3 %v533_v8  ;;  %v731_v19 = vld [vmem:[#allocation7 + $0x4f0] sm:$0xff]  ;;  %v1753_v8 = vld [vmem:[#allocation8 + $0xa] ss:$0 sm:$0xff] }
 0x280   :  { %425 = vmatmul.f32.gmra.mxu0 %v386_v20  ;;  %v730_v20 = vld [vmem:[#allocation7 + $0x4e8] sm:$0xff] }
 0x281   :  { %559 = vmatpush.msra.mxu3 %v532_v11  ;;  %v644_v11 = vld [vmem:[#allocation7 + $0x3b8] sm:$0xff] }
 0x283   :  { %560 = vmatpush.msra.mxu3 %v531_v12 }
 0x285   :  { %561 = vmatpush.msra.mxu3 %v530_v13  ;;  %v643_v13 = vld [vmem:[#allocation7 + $0x3b0] sm:$0xff] }
 0x287   :  { %562 = vmatpush.msra.mxu3 %v529_v16 }
 0x289   :  { %733 = vmatpush.msrb.mxu3 %v732_v18 }
 0x28b   :  { %734 = vmatpush.msrb.mxu3 %v731_v19  ;;  %v642_v19 = vld [vmem:[#allocation7 + $0x3a8] sm:$0xff] }
 0x28d   :  { %735 = vmatpush.msrb.mxu3 %v730_v20 }
 0x2f5   :  { %v423_v22 = vpop.f32.mrf.mxu0 }
 0x2f6   :  { %v424_v23 = vadd.f32 %v1748_v21, %v423_v22  ;;  %v728_v22 = vld [vmem:[#allocation7 + $0x4d8] sm:$0xff] }
 0x2f8   :  { %v431_v24 = vmin.f32 %v424_v23, 0.0  ;;  %vm429_vm7 = vcmp.gt.f32.partialorder %v424_v23, 0.0 }
 0x2fa   :  { %v433_v25 = vmul.f32 1.442695, %v431_v24  ;;  %v726_v24 = vld [vmem:[#allocation7 + $0x4c8] sm:$0xff] }
 0x2fc   :  { %1789 = vpow2.f32 %v433_v25  ;;  %v725_v25 = vld [vmem:[#allocation7 + $0x4c0] sm:$0xff] }
 0x2fd   :  { %v426_v26 = vpop.f32.mrf.mxu0 }
 0x2fe   :  { %v427_v29 = vadd.f32 %v1748_v21, %v426_v26  ;;  %v729_v21 = vld [vmem:[#allocation7 + $0x4e0] sm:$0xff]  ;;  %v724_v26 = vld [vmem:[#allocation7 + $0x4b8] sm:$0xff] }
 0x2ff   :  { %736 = vmatpush.msrb.mxu3 %v729_v21  ;;  %v669_v21 = vld [vmem:[#allocation7 + $0x478] sm:$0xff] }
 0x300   :  { %v432_v32 = vmin.f32 %v427_v29, 0.0  ;;  %vm430_vm8 = vcmp.gt.f32.partialorder %v427_v29, 0.0 }
 0x301   :  { %737 = vmatpush.msrb.mxu3 %v728_v22  ;;  %v641_v22 = vld [vmem:[#allocation7 + $0x3a0] sm:$0xff] }
 0x302   :  { %v435_v34 = vmul.f32 1.442695, %v432_v32  ;;  %v1790_v37 = vpop.eup %1789  ;;  %v719_v32 = vld [vmem:[#allocation7 + $0x490] sm:$0xff] }
 0x303   :  { %v1693_v39 = vadd.f32 -1.0, %v1790_v37 }
 0x304   :  { %1791 = vpow2.f32 %v435_v34  ;;  %v1751_v34 = vld [vmem:[#allocation8 + $0x8] ss:$0 sm:$0xff] }
 0x305   :  { %v439_v45 = vsel %vm429_vm7, %v424_v23, %v1693_v39  ;;  %v727_v23 = vld [vmem:[#allocation7 + $0x4d0] sm:$0xff] }
 0x306   :  { %v443_v51 = vmul.f32 %v1749_v43, %v439_v45  ;;  %738 = vmatpush.msrb.mxu3 %v727_v23  ;;  %v668_v23 = vld [vmem:[#allocation7 + $0x470] sm:$0xff] }
 0x308   :  { %v2056_v55 = vadd.f32 %v1750_v50, %v443_v51  ;;  %739 = vmatpush.msrb.mxu3 %v726_v24  ;;  %v1752_v51 = vld [vmem:[#allocation8 + $0x9] ss:$0 sm:$0xff]  ;;  %v640_v24 = vld [vmem:[#allocation7 + $0x398] sm:$0xff] }
 0x30a   :  { %v1792_v42 = vpop.eup %1791  ;;  %740 = vmatpush.msrb.mxu3 %v725_v25  ;;  %v667_v25 = vld [vmem:[#allocation7 + $0x468] sm:$0xff] }
 0x30b   :  { %v1694_v44 = vadd.f32 -1.0, %v1792_v42 }
 0x30c   :  { %741 = vmatpush.msrb.mxu3 %v724_v26  ;;  %v639_v26 = vld [vmem:[#allocation7 + $0x390] sm:$0xff] }
 0x30d   :  { %v440_v47 = vsel %vm430_vm8, %v427_v29, %v1694_v44  ;;  %v721_v29 = vld [vmem:[#allocation7 + $0x4a0] sm:$0xff] }
 0x30e   :  { %v444_v49 = vmul.f32 %v1749_v43, %v440_v47  ;;  %742 = vmatpush.msrb.mxu3 %v723_v27  ;;  %v666_v27 = vld [vmem:[#allocation7 + $0x460] sm:$0xff] }
 0x310   :  { %v2053_v53 = vadd.f32 %v1750_v50, %v444_v49  ;;  %743 = vmatpush.msrb.mxu3 %v722_v28  ;;  %v638_v28 = vld [vmem:[#allocation7 + $0x388] sm:$0xff] }
 0x312   :  { %463 = vmatpush.msrb.mxu1 %v2053_v53  ;;  %744 = vmatpush.msrb.mxu3 %v721_v29  ;;  %v665_v29 = vld [vmem:[#allocation7 + $0x458] sm:$0xff] }
 0x314   :  { %464 = vmatpush.msrb.mxu1 %v2056_v55  ;;  %745 = vmatpush.msrb.mxu3 %v720_v31  ;;  %v663_v31 = vld [vmem:[#allocation7 + $0x448] sm:$0xff] }
 0x315   :  { %1695 = vmatmul.msk.f32.vlgmr.msrb.gmra.mxu1 %vm232_vm4, %v2041_v7 }
 0x316   :  { %746 = vmatpush.msrb.mxu3 %v719_v32  ;;  %v662_v32 = vld [vmem:[#allocation7 + $0x440] sm:$0xff] }
 0x318   :  { %747 = vmatpush.msrb.mxu3 %v718_v33  ;;  %v661_v33 = vld [vmem:[#allocation7 + $0x438] sm:$0xff] }
 0x31a   :  { %748 = vmatpush.msrb.mxu3 %v717_v36  ;;  %v659_v36 = vld [vmem:[#allocation7 + $0x428] sm:$0xff] }
 0x31d   :  { %1696 = vmatmul.msk.f32.gmra.mxu1 %vm232_vm4, %v2047_v17 }
 0x392   :  { %v466_v9 = vpop.f32.mrf.mxu1 }
 0x393   :  { %v472_v10 = vmul.f32 0.0625, %v466_v9 }
 0x395   :  { %509 = vmatmul.f32.vlgmr.msra.gmra.mxu2 %v472_v10 }
 0x39a   :  { %v469_v14 = vpop.f32.mrf.mxu1 }
 0x39b   :  { %v473_v15 = vmul.f32 0.0625, %v469_v14 }
 0x39d   :  { %512 = vmatmul.f32.gmra.mxu2 %v473_v15  ;;  %v1754_v15 = vld [vmem:[#allocation8 + $0xb] ss:$0 sm:$0xff] }
 0x418   :  { %v510_v37 = vpop.f32.mrf.mxu2 }
 0x419   :  { %v511_v38 = vadd.f32 %v1751_v34, %v510_v37  ;;  %v658_v37 = vld [vmem:[#allocation7 + $0x420] sm:$0xff] }
 0x41b   :  { %v518_v39 = vmin.f32 %v511_v38, 0.0  ;;  %vm516_vm9 = vcmp.gt.f32.partialorder %v511_v38, 0.0 }
 0x41d   :  { %v520_v40 = vmul.f32 1.442695, %v518_v39  ;;  %v637_v39 = vld [vmem:[#allocation7 + $0x380] sm:$0xff] }
 0x41f   :  { %1793 = vpow2.f32 %v520_v40  ;;  %v655_v40 = vld [vmem:[#allocation7 + $0x408] sm:$0xff] }
 0x420   :  { %v513_v41 = vpop.f32.mrf.mxu2 }
 0x421   :  { %v514_v42 = vadd.f32 %v1751_v34, %v513_v41  ;;  %v660_v34 = vld [vmem:[#allocation7 + $0x430] sm:$0xff]  ;;  %v654_v41 = vld [vmem:[#allocation7 + $0x400] sm:$0xff] }
 0x423   :  { %v519_v43 = vmin.f32 %v514_v42, 0.0  ;;  %vm517_vm10 = vcmp.gt.f32.partialorder %v514_v42, 0.0 }
 0x425   :  { %v1794_v44 = vpop.eup %1793  ;;  %v522_v45 = vmul.f32 1.442695, %v519_v43  ;;  %v789_v43 = vld [vmem:[#allocation7 + $0x570] sm:$0xff] }
 0x426   :  { %v1697_v46 = vadd.f32 -1.0, %v1794_v44  ;;  %v788_v44 = vld [vmem:[#allocation7 + $0x568] sm:$0xff] }
 0x427   :  { %1795 = vpow2.f32 %v522_v45  ;;  %v787_v45 = vld [vmem:[#allocation7 + $0x560] sm:$0xff] }
 0x428   :  { %v526_v47 = vsel %vm516_vm9, %v511_v38, %v1697_v46  ;;  %v657_v38 = vld [vmem:[#allocation7 + $0x418] sm:$0xff] }
 0x429   :  { %563 = vmatmul.f32.vlgmr.msra.gmra.mxu3 %v526_v47  ;;  %v786_v46 = vld [vmem:[#allocation7 + $0x558] sm:$0xff] }
 0x42d   :  { %v1796_v48 = vpop.eup %1795 }
 0x42e   :  { %v1698_v49 = vadd.f32 -1.0, %v1796_v48 }
 0x430   :  { %v527_v50 = vsel %vm517_vm10, %v514_v42, %v1698_v49  ;;  %v790_v42 = vld [vmem:[#allocation7 + $0x578] sm:$0xff] }
 0x431   :  { %566 = vmatmul.f32.gmra.mxu3 %v527_v50 }
 0x439   :  { %749 = vmatmul.f32.vlgmr.msrb.gmra.mxu3 %v2056_v55  ;;  %v648_v55 = vld [vmem:[#allocation7 + $0x3d8] sm:$0xff] }
 0x43a   :  { %697 = vmatpush.msrb.mxu2 %v648_v55  ;;  %v851_v55 = vld [vmem:[#allocation7 + $0x5f0] sm:$0xff] }
 0x441   :  { %752 = vmatmul.f32.gmra.mxu3 %v2053_v53  ;;  %v647_v53 = vld [vmem:[#allocation7 + $0x3d0] sm:$0xff] }
 0x442   :  { %698 = vmatpush.msrb.mxu2 %v647_v53 }
 0x444   :  { %699 = vmatpush.msrb.mxu2 %v646_v4 }
 0x446   :  { %700 = vmatpush.msrb.mxu2 %v645_v5  ;;  %v1755_v5 = vld [vmem:[#allocation8 + $0xc] ss:$0 sm:$0xff] }
 0x448   :  { %701 = vmatpush.msrb.mxu2 %v644_v11 }
 0x44a   :  { %702 = vmatpush.msrb.mxu2 %v643_v13 }
 0x44c   :  { %703 = vmatpush.msrb.mxu2 %v642_v19 }
 0x44e   :  { %704 = vmatpush.msrb.mxu2 %v641_v22 }
 0x450   :  { %705 = vmatpush.msrb.mxu2 %v640_v24 }
 0x452   :  { %706 = vmatpush.msrb.mxu2 %v639_v26 }
 0x454   :  { %707 = vmatpush.msrb.mxu2 %v638_v28  ;;  %v847_v28 = vld [vmem:[#allocation7 + $0x5d0] sm:$0xff] }
 0x456   :  { %708 = vmatpush.msrb.mxu2 %v637_v39  ;;  %v837_v39 = vld [vmem:[#allocation7 + $0x580] sm:$0xff] }
 0x4ac   :  { %v564_v52 = vpop.f32.mrf.mxu3 }
 0x4ad   :  { %v565_v54 = vadd.f32 %v1752_v51, %v564_v52  ;;  %v784_v52 = vld [vmem:[#allocation7 + $0x548] sm:$0xff] }
 0x4af   :  { %v572_v56 = vmin.f32 %v565_v54, 0.0  ;;  %vm570_vm11 = vcmp.gt.f32.partialorder %v565_v54, 0.0 }
 0x4b1   :  { %v574_v57 = vmul.f32 1.442695, %v572_v56  ;;  %v782_v56 = vld [vmem:[#allocation7 + $0x538] sm:$0xff] }
 0x4b3   :  { %1797 = vpow2.f32 %v574_v57  ;;  %v781_v57 = vld [vmem:[#allocation7 + $0x530] sm:$0xff] }
 0x4b4   :  { %v567_v58 = vpop.f32.mrf.mxu3 }
 0x4b5   :  { %v568_v61 = vadd.f32 %v1752_v51, %v567_v58  ;;  %v785_v51 = vld [vmem:[#allocation7 + $0x550] sm:$0xff]  ;;  %v780_v58 = vld [vmem:[#allocation7 + $0x528] sm:$0xff] }
 0x4b7   :  { %v573_v63 = vmin.f32 %v568_v61, 0.0  ;;  %vm571_vm12 = vcmp.gt.f32.partialorder %v568_v61, 0.0 }
 0x4b9   :  { %v576_v1 = vmul.f32 1.442695, %v573_v63  ;;  %v1798_v2 = vpop.eup %1797  ;;  %v775_v63 = vld [vmem:[#allocation7 + $0x500] sm:$0xff] }
 0x4ba   :  { %v1699_v3 = vadd.f32 -1.0, %v1798_v2  ;;  %v850_v2 = vld [vmem:[#allocation7 + $0x5e8] sm:$0xff] }
 0x4bb   :  { %1799 = vpow2.f32 %v576_v1  ;;  %v852_v1 = vld [vmem:[#allocation7 + $0x5f8] sm:$0xff] }
 0x4bc   :  { %v580_v9 = vsel %vm570_vm11, %v565_v54, %v1699_v3  ;;  %v783_v54 = vld [vmem:[#allocation7 + $0x540] sm:$0xff]  ;;  %v750_v53 = vpop.f32.mrf.mxu3 }
 0x4bd   :  { %v584_v16 = vmul.f32 %v1753_v8, %v580_v9  ;;  %v848_v9 = vld [vmem:[#allocation7 + $0x5d8] sm:$0xff] }
 0x4bf   :  { %v588_v20 = vadd.f32 %v1754_v15, %v584_v16 }
 0x4c1   :  { %v1800_v6 = vpop.eup %1799 }
 0x4c2   :  { %v1700_v10 = vadd.f32 -1.0, %v1800_v6  ;;  %v849_v6 = vld [vmem:[#allocation7 + $0x5e0] sm:$0xff] }
 0x4c4   :  { %v581_v12 = vsel %vm571_vm12, %v568_v61, %v1700_v10  ;;  %v777_v61 = vld [vmem:[#allocation7 + $0x510] sm:$0xff]  ;;  %v753_v16 = vpop.f32.mrf.mxu3 }
 0x4c5   :  { %v585_v14 = vmul.f32 %v1753_v8, %v581_v12 }
 0x4c7   :  { %v589_v18 = vadd.f32 %v1754_v15, %v585_v14 }
 0x4c9   :  { %604 = vmatpush.msra.mxu1 %v589_v18  ;;  %627 = vmatpush.msra.mxu0 %v589_v18 }
 0x4cb   :  { %605 = vmatpush.msra.mxu1 %v588_v20  ;;  %628 = vmatpush.msra.mxu0 %v588_v20 }
 0x4cc   :  { %1701 = vmatmul.msk.f32.vlgmr.msra.gmra.mxu1 %vm232_vm4, %v2041_v7  ;;  %1703 = vmatmul.msk.f32.vlgmr.msra.gmra.mxu0 %vm232_vm4, %v2035_v30  ;;  %v664_v30 = vld [vmem:[#allocation7 + $0x450] sm:$0xff] }
 0x4cd   :  { %670 = vmatpush.msrb.mxu1 %v669_v21  ;;  %793 = vmatpush.msrb.mxu0 %v790_v42  ;;  %v894_v42 = vld [vmem:[#allocation7 + $0x668] sm:$0xff] }
 0x4cf   :  { %671 = vmatpush.msrb.mxu1 %v668_v23  ;;  %794 = vmatpush.msrb.mxu0 %v789_v43 }
 0x4d1   :  { %672 = vmatpush.msrb.mxu1 %v667_v25  ;;  %795 = vmatpush.msrb.mxu0 %v788_v44 }
 0x4d3   :  { %673 = vmatpush.msrb.mxu1 %v666_v27  ;;  %796 = vmatpush.msrb.mxu0 %v787_v45  ;;  %v893_v45 = vld [vmem:[#allocation7 + $0x660] sm:$0xff] }
 0x4d4   :  { %1702 = vmatmul.msk.f32.gmra.mxu1 %vm232_vm4, %v2047_v17  ;;  %1704 = vmatmul.msk.f32.gmra.mxu0 %vm232_vm4, %v2038_v35  ;;  %v656_v35 = vld [vmem:[#allocation7 + $0x410] sm:$0xff] }
 0x4d5   :  { %674 = vmatpush.msrb.mxu1 %v665_v29  ;;  %797 = vmatpush.msrb.mxu0 %v786_v46  ;;  %v846_v29 = vld [vmem:[#allocation7 + $0x5c8] sm:$0xff] }
 0x4d7   :  { %675 = vmatpush.msrb.mxu1 %v664_v30  ;;  %798 = vmatpush.msrb.mxu0 %v785_v51  ;;  %v845_v30 = vld [vmem:[#allocation7 + $0x5c0] sm:$0xff] }
 0x4d9   :  { %676 = vmatpush.msrb.mxu1 %v663_v31  ;;  %799 = vmatpush.msrb.mxu0 %v784_v52  ;;  %v844_v31 = vld [vmem:[#allocation7 + $0x5b8] sm:$0xff] }
 0x4db   :  { %677 = vmatpush.msrb.mxu1 %v662_v32  ;;  %800 = vmatpush.msrb.mxu0 %v783_v54  ;;  %v843_v32 = vld [vmem:[#allocation7 + $0x5b0] sm:$0xff]  ;;  %v889_v54 = vld [vmem:[#allocation7 + $0x640] sm:$0xff] }
 0x4dd   :  { %678 = vmatpush.msrb.mxu1 %v661_v33  ;;  %801 = vmatpush.msrb.mxu0 %v782_v56  ;;  %v842_v33 = vld [vmem:[#allocation7 + $0x5a8] sm:$0xff] }
 0x4df   :  { %679 = vmatpush.msrb.mxu1 %v660_v34  ;;  %802 = vmatpush.msrb.mxu0 %v781_v57  ;;  %v841_v34 = vld [vmem:[#allocation7 + $0x5a0] sm:$0xff]  ;;  %v888_v57 = vld [vmem:[#allocation7 + $0x638] sm:$0xff] }
 0x4e1   :  { %680 = vmatpush.msrb.mxu1 %v659_v36  ;;  %803 = vmatpush.msrb.mxu0 %v780_v58  ;;  %v840_v36 = vld [vmem:[#allocation7 + $0x598] sm:$0xff] }
 0x4e3   :  { %681 = vmatpush.msrb.mxu1 %v658_v37  ;;  %804 = vmatpush.msrb.mxu0 %v779_v59  ;;  %v839_v37 = vld [vmem:[#allocation7 + $0x590] sm:$0xff]  ;;  %v1757_v59 = vld [vmem:[#allocation8 + $0xe] ss:$0 sm:$0xff] }
 0x4e5   :  { %682 = vmatpush.msrb.mxu1 %v657_v38  ;;  %805 = vmatpush.msrb.mxu0 %v778_v60  ;;  %v838_v38 = vld [vmem:[#allocation7 + $0x588] sm:$0xff] }
 0x4e7   :  { %683 = vmatpush.msrb.mxu1 %v656_v35  ;;  %806 = vmatpush.msrb.mxu0 %v777_v61  ;;  %v1756_v35 = vld [vmem:[#allocation8 + $0xd] ss:$0 sm:$0xff]  ;;  %v887_v61 = vld [vmem:[#allocation7 + $0x630] sm:$0xff] }
 0x4e9   :  { %684 = vmatpush.msrb.mxu1 %v655_v40  ;;  %807 = vmatpush.msrb.mxu0 %v776_v62  ;;  %v896_v40 = vld [vmem:[#allocation7 + $0x678] sm:$0xff] }
 0x4ea   :  { %899 = vmatpush.msra.mxu2 %v896_v40 }
 0x4eb   :  { %685 = vmatpush.msrb.mxu1 %v654_v41  ;;  %808 = vmatpush.msrb.mxu0 %v775_v63  ;;  %v895_v41 = vld [vmem:[#allocation7 + $0x670] sm:$0xff]  ;;  %v1758_v63 = vld [vmem:[#allocation8 + $0xf] ss:$0 sm:$0xff] }
 0x4ec   :  { %900 = vmatpush.msra.mxu2 %v895_v41 }
 0x4ed   :  { %855 = vmatpush.msra.mxu1 %v852_v1 }
 0x4ee   :  { %901 = vmatpush.msra.mxu2 %v894_v42 }
 0x4ef   :  { %856 = vmatpush.msra.mxu1 %v851_v55 }
 0x4f0   :  { %902 = vmatpush.msra.mxu2 %v893_v45 }
 0x4f1   :  { %857 = vmatpush.msra.mxu1 %v850_v2  ;;  %v885_v2 = vld [vmem:[#allocation7 + $0x620] sm:$0xff] }
 0x4f3   :  { %858 = vmatpush.msra.mxu1 %v849_v6 }
 0x4f5   :  { %859 = vmatpush.msra.mxu1 %v848_v9 }
 0x4f7   :  { %860 = vmatpush.msra.mxu1 %v847_v28  ;;  %v943_v28 = vld [vmem:[#allocation7 + $0x6c0] sm:$0xff] }
 0x4f9   :  { %861 = vmatpush.msra.mxu1 %v846_v29  ;;  %v942_v29 = vld [vmem:[#allocation7 + $0x6b8] sm:$0xff] }
 0x4fb   :  { %862 = vmatpush.msra.mxu1 %v845_v30  ;;  %v941_v30 = vld [vmem:[#allocation7 + $0x6b0] sm:$0xff] }
 0x4fd   :  { %863 = vmatpush.msra.mxu1 %v844_v31  ;;  %v940_v31 = vld [vmem:[#allocation7 + $0x6a8] sm:$0xff] }
 0x4ff   :  { %864 = vmatpush.msra.mxu1 %v843_v32  ;;  %v939_v32 = vld [vmem:[#allocation7 + $0x6a0] sm:$0xff] }
 0x501   :  { %865 = vmatpush.msra.mxu1 %v842_v33  ;;  %v938_v33 = vld [vmem:[#allocation7 + $0x698] sm:$0xff] }
 0x503   :  { %866 = vmatpush.msra.mxu1 %v841_v34  ;;  %v937_v34 = vld [vmem:[#allocation7 + $0x690] sm:$0xff] }
 0x505   :  { %867 = vmatpush.msra.mxu1 %v840_v36  ;;  %v936_v36 = vld [vmem:[#allocation7 + $0x688] sm:$0xff] }
 0x507   :  { %868 = vmatpush.msra.mxu1 %v839_v37  ;;  %v935_v37 = vld [vmem:[#allocation7 + $0x680] sm:$0xff] }
 0x509   :  { %869 = vmatpush.msra.mxu1 %v838_v38  ;;  %v1760_v38 = vld [vmem:[#allocation8 + $0x11] ss:$0 sm:$0xff] }
 0x50b   :  { %870 = vmatpush.msra.mxu1 %v837_v39 }
 0x549   :  { %v607_v47 = vpop.f32.mrf.mxu1  ;;  %v630_v48 = vpop.f32.mrf.mxu0 }
 0x54a   :  { %709 = vmatmul.f32.vlgmr.msrb.gmra.mxu2 %v607_v47  ;;  %686 = vmatmul.f32.vlgmr.msrb.gmra.mxu1 %v630_v48  ;;  %v892_v47 = vld [vmem:[#allocation7 + $0x658] sm:$0xff] }
 0x54b   :  { %903 = vmatpush.msra.mxu2 %v892_v47 }
 0x551   :  { %v610_v49 = vpop.f32.mrf.mxu1  ;;  %v633_v50 = vpop.f32.mrf.mxu0 }
 0x552   :  { %712 = vmatmul.f32.gmra.mxu2 %v610_v49  ;;  %689 = vmatmul.f32.gmra.mxu1 %v633_v50  ;;  %v891_v49 = vld [vmem:[#allocation7 + $0x650] sm:$0xff]  ;;  %v890_v50 = vld [vmem:[#allocation7 + $0x648] sm:$0xff] }
 0x553   :  { %904 = vmatpush.msra.mxu2 %v891_v49 }
 0x555   :  { %905 = vmatpush.msra.mxu2 %v890_v50 }
 0x557   :  { %906 = vmatpush.msra.mxu2 %v889_v54 }
 0x559   :  { %907 = vmatpush.msra.mxu2 %v888_v57 }
 0x55b   :  { %908 = vmatpush.msra.mxu2 %v887_v61 }
 0x5c7   :  { %v687_v0 = vpop.f32.mrf.mxu1 }
 0x5cd   :  { %v710_v3 = vpop.f32.mrf.mxu2 }
 0x5ce   :  { %v711_v4 = vadd.f32 %v710_v3, %v687_v0  ;;  %v886_v0 = vld [vmem:[#allocation7 + $0x628] sm:$0xff]  ;;  %v884_v3 = vld [vmem:[#allocation7 + $0x618] sm:$0xff] }
 0x5cf   :  { %v690_v11 = vpop.f32.mrf.mxu1  ;;  %909 = vmatpush.msra.mxu2 %v886_v0 }
 0x5d0   :  { %v756_v8 = vadd.f32 %v750_v53, %v711_v4 }
 0x5d1   :  { %910 = vmatpush.msra.mxu2 %v885_v2 }
 0x5d2   :  { %v760_v10 = vadd.f32 %v1755_v5, %v756_v8 }
 0x5d3   :  { %911 = vmatpush.msra.mxu2 %v884_v3 }
 0x5d4   :  { %v764_v12 = vmin.f32 %v760_v10, 0.0  ;;  %vm762_vm13 = vcmp.gt.f32.partialorder %v760_v10, 0.0 }
 0x5d5   :  { %v713_v13 = vpop.f32.mrf.mxu2 }
 0x5d6   :  { %v766_v14 = vmul.f32 1.442695, %v764_v12  ;;  %v714_v15 = vadd.f32 %v713_v13, %v690_v11  ;;  %v882_v11 = vld [vmem:[#allocation7 + $0x608] sm:$0xff]  ;;  %v881_v12 = vld [vmem:[#allocation7 + $0x600] sm:$0xff]  ;;  %v950_v13 = vld [vmem:[#allocation7 + $0x6f8] sm:$0xff] }
 0x5d7   :  { %953 = vmatpush.msra.mxu3 %v950_v13  ;;  %v1074_v13 = vld [vmem:[#allocation7 + $0x7f0] sm:$0xff] }
 0x5d8   :  { %v757_v18 = vadd.f32 %v753_v16, %v714_v15  ;;  %1801 = vpow2.f32 %v766_v14  ;;  %v949_v14 = vld [vmem:[#allocation7 + $0x6f0] sm:$0xff]  ;;  %v948_v15 = vld [vmem:[#allocation7 + $0x6e8] sm:$0xff]  ;;  %v947_v16 = vld [vmem:[#allocation7 + $0x6e0] sm:$0xff] }
 0x5d9   :  { %954 = vmatpush.msra.mxu3 %v949_v14  ;;  %v1055_v14 = vld [vmem:[#allocation7 + $0x760] sm:$0xff] }
 0x5da   :  { %v761_v19 = vadd.f32 %v1755_v5, %v757_v18  ;;  %v946_v18 = vld [vmem:[#allocation7 + $0x6d8] sm:$0xff] }
 0x5db   :  { %955 = vmatpush.msra.mxu3 %v948_v15 }
 0x5dc   :  { %v765_v20 = vmin.f32 %v761_v19, 0.0  ;;  %vm763_vm14 = vcmp.gt.f32.partialorder %v761_v19, 0.0 }
 0x5dd   :  { %956 = vmatpush.msra.mxu3 %v947_v16  ;;  %v1073_v16 = vld [vmem:[#allocation7 + $0x7e8] sm:$0xff] }
 0x5de   :  { %v1802_v21 = vpop.eup %1801  ;;  %v768_v22 = vmul.f32 1.442695, %v765_v20  ;;  %v944_v20 = vld [vmem:[#allocation7 + $0x6c8] sm:$0xff] }
 0x5df   :  { %v1705_v23 = vadd.f32 -1.0, %v1802_v21  ;;  %957 = vmatpush.msra.mxu3 %v946_v18  ;;  %v1759_v21 = vld [vmem:[#allocation8 + $0x10] ss:$0 sm:$0xff]  ;;  %v1054_v18 = vld [vmem:[#allocation7 + $0x758] sm:$0xff] }
 0x5e0   :  { %1803 = vpow2.f32 %v768_v22 }
 0x5e1   :  { %v772_v24 = vsel %vm762_vm13, %v760_v10, %v1705_v23  ;;  %v883_v10 = vld [vmem:[#allocation7 + $0x610] sm:$0xff] }
 0x5e2   :  { %809 = vmatmul.f32.vlgmr.msrb.gmra.mxu0 %v772_v24  ;;  %912 = vmatpush.msra.mxu2 %v883_v10  ;;  %v1056_v10 = vld [vmem:[#allocation7 + $0x768] sm:$0xff] }
 0x5e4   :  { %913 = vmatpush.msra.mxu2 %v882_v11  ;;  %v1075_v11 = vld [vmem:[#allocation7 + $0x7f8] sm:$0xff] }
 0x5e5   :  { %1076 = vmatpush.msrb.mxu1 %v1075_v11 }
 0x5e6   :  { %v1804_v25 = vpop.eup %1803  ;;  %914 = vmatpush.msra.mxu2 %v881_v12 }
 0x5e7   :  { %v1706_v26 = vadd.f32 -1.0, %v1804_v25  ;;  %1077 = vmatpush.msrb.mxu1 %v1074_v13 }
 0x5e9   :  { %v773_v27 = vsel %vm763_vm14, %v761_v19, %v1706_v26  ;;  %v945_v19 = vld [vmem:[#allocation7 + $0x6d0] sm:$0xff]  ;;  %1078 = vmatpush.msrb.mxu1 %v1073_v16 }
 0x5ea   :  { %812 = vmatmul.f32.gmra.mxu0 %v773_v27  ;;  %958 = vmatpush.msra.mxu3 %v945_v19  ;;  %v1072_v19 = vld [vmem:[#allocation7 + $0x7e0] sm:$0xff] }
 0x5eb   :  { %1079 = vmatpush.msrb.mxu1 %v1072_v19 }
 0x5ec   :  { %959 = vmatpush.msra.mxu3 %v944_v20  ;;  %v1053_v20 = vld [vmem:[#allocation7 + $0x750] sm:$0xff] }
 0x5ee   :  { %960 = vmatpush.msra.mxu3 %v943_v28  ;;  %v1048_v28 = vld [vmem:[#allocation7 + $0x728] sm:$0xff] }
 0x5f0   :  { %961 = vmatpush.msra.mxu3 %v942_v29  ;;  %v1047_v29 = vld [vmem:[#allocation7 + $0x720] sm:$0xff] }
 0x5f2   :  { %962 = vmatpush.msra.mxu3 %v941_v30  ;;  %v1046_v30 = vld [vmem:[#allocation7 + $0x718] sm:$0xff] }
 0x5f4   :  { %963 = vmatpush.msra.mxu3 %v940_v31  ;;  %v2077_v31 = vld [vmem:[#allocation5] sm:$0xff] }
 0x5f6   :  { %964 = vmatpush.msra.mxu3 %v939_v32  ;;  %v1045_v32 = vld [vmem:[#allocation7 + $0x710] sm:$0xff] }
 0x5f8   :  { %965 = vmatpush.msra.mxu3 %v938_v33  ;;  %v1044_v33 = vld [vmem:[#allocation7 + $0x708] sm:$0xff] }
 0x5fa   :  { %966 = vmatpush.msra.mxu3 %v937_v34  ;;  %v2081_v34 = vld [vmem:[#allocation5 + $0x8] sm:$0xff] }
 0x5fc   :  { %967 = vmatpush.msra.mxu3 %v936_v36  ;;  %v1068_v36 = vld [vmem:[#allocation7 + $0x7c0] sm:$0xff] }
 0x5fe   :  { %968 = vmatpush.msra.mxu3 %v935_v37  ;;  %v1043_v37 = vld [vmem:[#allocation7 + $0x700] sm:$0xff] }
 0x65f   :  { %v810_v43 = vpop.f32.mrf.mxu0 }
 0x660   :  { %v811_v44 = vadd.f32 %v1756_v35, %v810_v43 }
 0x662   :  { %v818_v46 = vmin.f32 %v811_v44, 0.0  ;;  %vm816_vm15 = vcmp.gt.f32.partialorder %v811_v44, 0.0 }
 0x664   :  { %v820_v48 = vmul.f32 1.442695, %v818_v46 }
 0x666   :  { %1805 = vpow2.f32 %v820_v48 }
 0x667   :  { %v813_v51 = vpop.f32.mrf.mxu0 }
 0x668   :  { %v814_v52 = vadd.f32 %v1756_v35, %v813_v51 }
 0x66a   :  { %v819_v56 = vmin.f32 %v814_v52, 0.0  ;;  %vm817_vm0 = vcmp.gt.f32.partialorder %v814_v52, 0.0 }
 0x66c   :  { %v1806_v58 = vpop.eup %1805  ;;  %v822_v60 = vmul.f32 1.442695, %v819_v56 }
 0x66d   :  { %v1707_v62 = vadd.f32 -1.0, %v1806_v58 }
 0x66e   :  { %1807 = vpow2.f32 %v822_v60 }
 0x66f   :  { %v826_v1 = vsel %vm816_vm15, %v811_v44, %v1707_v62 }
 0x670   :  { %v830_v55 = vmul.f32 %v1757_v59, %v826_v1 }
 0x672   :  { %v834_v53 = vadd.f32 %v1758_v63, %v830_v55  ;;  %v1762_v55 = vld [vmem:[#allocation8 + $0x13] ss:$0 sm:$0xff] }
 0x674   :  { %v1808_v4 = vpop.eup %1807  ;;  %871 = vmatmul.f32.vlgmr.msra.gmra.mxu1 %v834_v53 }
 0x675   :  { %v1708_v5 = vadd.f32 -1.0, %v1808_v4  ;;  %v1058_v4 = vld [vmem:[#allocation7 + $0x778] sm:$0xff] }
 0x676   :  { %1099 = vmatpush.msrb.mxu2 %v1058_v4 }
 0x677   :  { %v827_v6 = vsel %vm817_vm0, %v814_v52, %v1708_v5  ;;  %v1761_v52 = vld [vmem:[#allocation8 + $0x12] ss:$0 sm:$0xff] }
 0x678   :  { %v831_v8 = vmul.f32 %v1757_v59, %v827_v6  ;;  %v1057_v5 = vld [vmem:[#allocation7 + $0x770] sm:$0xff] }
 0x679   :  { %1100 = vmatpush.msrb.mxu2 %v1057_v5 }
 0x67a   :  { %v835_v9 = vadd.f32 %v1758_v63, %v831_v8  ;;  %v1763_v8 = vld [vmem:[#allocation8 + $0x14] ss:$0 sm:$0xff] }
 0x67b   :  { %1101 = vmatpush.msrb.mxu2 %v1056_v10 }
 0x67c   :  { %874 = vmatmul.f32.gmra.mxu1 %v835_v9 }
 0x67d   :  { %1102 = vmatpush.msrb.mxu2 %v1055_v14 }
 0x67f   :  { %1103 = vmatpush.msrb.mxu2 %v1054_v18 }
 0x681   :  { %1104 = vmatpush.msrb.mxu2 %v1053_v20 }
 0x6f1   :  { %v872_v22 = vpop.f32.mrf.mxu1 }
 0x6f2   :  { %v873_v23 = vadd.f32 %v1759_v21, %v872_v22  ;;  %v1052_v22 = vld [vmem:[#allocation7 + $0x748] sm:$0xff] }
 0x6f3   :  { %1105 = vmatpush.msrb.mxu2 %v1052_v22  ;;  %v1765_v22 = vld [vmem:[#allocation8 + $0x16] ss:$0 sm:$0xff] }
 0x6f4   :  { %v878_v24 = vmax.f32 %v873_v23, 0.0  ;;  %v1070_v23 = vld [vmem:[#allocation7 + $0x7d0] sm:$0xff] }
 0x6f6   :  { %915 = vmatmul.f32.vlgmr.msra.gmra.mxu2 %v878_v24  ;;  %v1051_v24 = vld [vmem:[#allocation7 + $0x740] sm:$0xff] }
 0x6f7   :  { %1106 = vmatpush.msrb.mxu2 %v1051_v24 }
 0x6f9   :  { %v875_v25 = vpop.f32.mrf.mxu1 }
 0x6fa   :  { %v876_v26 = vadd.f32 %v1759_v21, %v875_v25  ;;  %v1071_v21 = vld [vmem:[#allocation7 + $0x7d8] sm:$0xff]  ;;  %v1069_v25 = vld [vmem:[#allocation7 + $0x7c8] sm:$0xff] }
 0x6fb   :  { %1080 = vmatpush.msrb.mxu1 %v1071_v21 }
 0x6fc   :  { %v879_v27 = vmax.f32 %v876_v26, 0.0  ;;  %v1050_v26 = vld [vmem:[#allocation7 + $0x738] sm:$0xff] }
 0x6fd   :  { %1081 = vmatpush.msrb.mxu1 %v1070_v23  ;;  %1107 = vmatpush.msrb.mxu2 %v1050_v26 }
 0x6fe   :  { %918 = vmatmul.f32.gmra.mxu2 %v879_v27  ;;  %v1049_v27 = vld [vmem:[#allocation7 + $0x730] sm:$0xff] }
 0x6ff   :  { %1082 = vmatpush.msrb.mxu1 %v1069_v25  ;;  %1108 = vmatpush.msrb.mxu2 %v1049_v27 }
 0x701   :  { %1109 = vmatpush.msrb.mxu2 %v1048_v28  ;;  %1083 = vmatpush.msrb.mxu1 %v1068_v36 }
 0x703   :  { %1110 = vmatpush.msrb.mxu2 %v1047_v29 }
 0x705   :  { %1111 = vmatpush.msrb.mxu2 %v1046_v30 }
 0x707   :  { %1112 = vmatpush.msrb.mxu2 %v1045_v32 }
 0x709   :  { %1113 = vmatpush.msrb.mxu2 %v1044_v33 }
 0x70b   :  { %1114 = vmatpush.msrb.mxu2 %v1043_v37  ;;  %v1766_v37 = vld [vmem:[#allocation8 + $0x17] ss:$0 sm:$0xff] }
 0x779   :  { %v916_v39 = vpop.f32.mrf.mxu2 }
 0x77a   :  { %v917_v35 = vadd.f32 %v1760_v38, %v916_v39  ;;  %v1066_v39 = vld [vmem:[#allocation7 + $0x7b0] sm:$0xff] }
 0x77c   :  { %v924_v40 = vmin.f32 %v917_v35, 0.0  ;;  %vm922_vm1 = vcmp.gt.f32.partialorder %v917_v35, 0.0 }
 0x77e   :  { %v926_v41 = vmul.f32 1.442695, %v924_v40  ;;  %v1064_v40 = vld [vmem:[#allocation7 + $0x7a0] sm:$0xff] }
 0x780   :  { %1809 = vpow2.f32 %v926_v41  ;;  %v1063_v41 = vld [vmem:[#allocation7 + $0x798] sm:$0xff] }
 0x781   :  { %v919_v42 = vpop.f32.mrf.mxu2 }
 0x782   :  { %v920_v43 = vadd.f32 %v1760_v38, %v919_v42  ;;  %v1067_v38 = vld [vmem:[#allocation7 + $0x7b8] sm:$0xff]  ;;  %v1062_v42 = vld [vmem:[#allocation7 + $0x790] sm:$0xff] }
 0x783   :  { %1084 = vmatpush.msrb.mxu1 %v1067_v38 }
 0x784   :  { %v925_v44 = vmin.f32 %v920_v43, 0.0  ;;  %vm923_vm2 = vcmp.gt.f32.partialorder %v920_v43, 0.0 }
 0x785   :  { %1085 = vmatpush.msrb.mxu1 %v1066_v39 }
 0x786   :  { %v1810_v45 = vpop.eup %1809  ;;  %v928_v46 = vmul.f32 1.442695, %v925_v44  ;;  %v1060_v44 = vld [vmem:[#allocation7 + $0x780] sm:$0xff] }
 0x787   :  { %v1709_v47 = vadd.f32 -1.0, %v1810_v45  ;;  %v1154_v45 = vld [vmem:[#allocation7 + $0x878] sm:$0xff] }
 0x788   :  { %1811 = vpow2.f32 %v928_v46  ;;  %1157 = vmatpush.msrb.mxu3 %v1154_v45  ;;  %v1241_v45 = vld [vmem:[#allocation7 + $0x8f8] sm:$0xff] }
 0x789   :  { %v932_v48 = vsel %vm922_vm1, %v917_v35, %v1709_v47  ;;  %v1065_v35 = vld [vmem:[#allocation7 + $0x7a8] sm:$0xff] }
 0x78a   :  { %969 = vmatmul.f32.vlgmr.msra.gmra.mxu3 %v932_v48  ;;  %1086 = vmatpush.msrb.mxu1 %v1065_v35 }
 0x78c   :  { %1087 = vmatpush.msrb.mxu1 %v1064_v40 }
 0x78e   :  { %v1812_v49 = vpop.eup %1811  ;;  %1088 = vmatpush.msrb.mxu1 %v1063_v41  ;;  %v1767_v41 = vld [vmem:[#allocation8 + $0x18] ss:$0 sm:$0xff] }
 0x78f   :  { %v1710_v50 = vadd.f32 -1.0, %v1812_v49 }
 0x790   :  { %1089 = vmatpush.msrb.mxu1 %v1062_v42 }
 0x791   :  { %v933_v51 = vsel %vm923_vm2, %v920_v43, %v1710_v50  ;;  %v1061_v43 = vld [vmem:[#allocation7 + $0x788] sm:$0xff]  ;;  %v1153_v50 = vld [vmem:[#allocation7 + $0x870] sm:$0xff] }
 0x792   :  { %972 = vmatmul.f32.gmra.mxu3 %v933_v51  ;;  %1090 = vmatpush.msrb.mxu1 %v1061_v43  ;;  %v1152_v51 = vld [vmem:[#allocation7 + $0x868] sm:$0xff] }
 0x793   :  { %1158 = vmatpush.msrb.mxu3 %v1153_v50  ;;  %v1236_v50 = vld [vmem:[#allocation7 + $0x8d0] sm:$0xff] }
 0x794   :  { %1091 = vmatpush.msrb.mxu1 %v1060_v44 }
 0x795   :  { %1159 = vmatpush.msrb.mxu3 %v1152_v51  ;;  %v1235_v51 = vld [vmem:[#allocation7 + $0x8c8] sm:$0xff] }
 0x80d   :  { %v970_v54 = vpop.f32.mrf.mxu3 }
 0x80e   :  { %v971_v56 = vadd.f32 %v1761_v52, %v970_v54  ;;  %v1150_v54 = vld [vmem:[#allocation7 + $0x858] sm:$0xff] }
 0x810   :  { %v978_v57 = vmin.f32 %v971_v56, 0.0  ;;  %vm976_vm3 = vcmp.gt.f32.partialorder %v971_v56, 0.0 }
 0x812   :  { %v980_v58 = vmul.f32 1.442695, %v978_v57  ;;  %v1148_v57 = vld [vmem:[#allocation7 + $0x848] sm:$0xff] }
 0x814   :  { %1813 = vpow2.f32 %v980_v58  ;;  %v1147_v58 = vld [vmem:[#allocation7 + $0x840] sm:$0xff] }
 0x815   :  { %v973_v59 = vpop.f32.mrf.mxu3 }
 0x816   :  { %v974_v60 = vadd.f32 %v1761_v52, %v973_v59  ;;  %v1151_v52 = vld [vmem:[#allocation7 + $0x860] sm:$0xff]  ;;  %v1146_v59 = vld [vmem:[#allocation7 + $0x838] sm:$0xff] }
 0x817   :  { %1160 = vmatpush.msrb.mxu3 %v1151_v52  ;;  %v1234_v52 = vld [vmem:[#allocation7 + $0x8c0] sm:$0xff] }
 0x818   :  { %v979_v61 = vmin.f32 %v974_v60, 0.0  ;;  %vm977_vm5 = vcmp.gt.f32.partialorder %v974_v60, 0.0 }
 0x819   :  { %1161 = vmatpush.msrb.mxu3 %v1150_v54  ;;  %v1233_v54 = vld [vmem:[#allocation7 + $0x8b8] sm:$0xff] }
 0x81a   :  { %v982_v62 = vmul.f32 1.442695, %v979_v61  ;;  %v1814_v63 = vpop.eup %1813  ;;  %v1144_v61 = vld [vmem:[#allocation7 + $0x828] sm:$0xff] }
 0x81b   :  { %v1711_v0 = vadd.f32 -1.0, %v1814_v63  ;;  %v1142_v63 = vld [vmem:[#allocation7 + $0x818] sm:$0xff] }
 0x81c   :  { %1815 = vpow2.f32 %v982_v62  ;;  %v1143_v62 = vld [vmem:[#allocation7 + $0x820] sm:$0xff] }
 0x81d   :  { %v986_v2 = vsel %vm976_vm3, %v971_v56, %v1711_v0  ;;  %v1149_v56 = vld [vmem:[#allocation7 + $0x850] sm:$0xff] }
 0x81e   :  { %v990_v9 = vmul.f32 %v1762_v55, %v986_v2  ;;  %1162 = vmatpush.msrb.mxu3 %v1149_v56  ;;  %v1141_v0 = vld [vmem:[#allocation7 + $0x810] sm:$0xff] }
 0x81f   :  { %v1232_v56 = vld [vmem:[#allocation7 + $0x8b0] sm:$0xff] }
 0x820   :  { %v994_v15 = vadd.f32 %v1763_v8, %v990_v9  ;;  %1163 = vmatpush.msrb.mxu3 %v1148_v57  ;;  %v1231_v57 = vld [vmem:[#allocation7 + $0x8a8] sm:$0xff] }
 0x822   :  { %v1816_v1 = vpop.eup %1815  ;;  %1164 = vmatpush.msrb.mxu3 %v1147_v58  ;;  %v1230_v58 = vld [vmem:[#allocation7 + $0x8a0] sm:$0xff] }
 0x823   :  { %v1712_v53 = vadd.f32 -1.0, %v1816_v1  ;;  %v1140_v1 = vld [vmem:[#allocation7 + $0x808] sm:$0xff] }
 0x824   :  { %1165 = vmatpush.msrb.mxu3 %v1146_v59  ;;  %v1229_v59 = vld [vmem:[#allocation7 + $0x898] sm:$0xff] }
 0x825   :  { %v987_v3 = vsel %vm977_vm5, %v974_v60, %v1712_v53  ;;  %v1145_v60 = vld [vmem:[#allocation7 + $0x830] sm:$0xff] }
 0x826   :  { %v991_v6 = vmul.f32 %v1762_v55, %v987_v3  ;;  %1166 = vmatpush.msrb.mxu3 %v1145_v60  ;;  %v1139_v55 = vld [vmem:[#allocation7 + $0x800] sm:$0xff]  ;;  %v1764_v53 = vld [vmem:[#allocation8 + $0x15] ss:$0 sm:$0xff] }
 0x827   :  { %v1228_v60 = vld [vmem:[#allocation7 + $0x890] sm:$0xff] }
 0x828   :  { %v995_v12 = vadd.f32 %v1763_v8, %v991_v6  ;;  %1167 = vmatpush.msrb.mxu3 %v1144_v61  ;;  %v1227_v61 = vld [vmem:[#allocation7 + $0x888] sm:$0xff] }
 0x82a   :  { %1010 = vmatpush.msra.mxu0 %v995_v12  ;;  %1168 = vmatpush.msrb.mxu3 %v1143_v62  ;;  %v1226_v62 = vld [vmem:[#allocation7 + $0x880] sm:$0xff] }
 0x82c   :  { %1011 = vmatpush.msra.mxu0 %v994_v15  ;;  %1169 = vmatpush.msrb.mxu3 %v1142_v63  ;;  %v1483_v63 = vld [vmem:[#allocation7 + $0xaf8] sm:$0xff] }
 0x82d   :  { %1713 = vmatmul.msk.f32.vlgmr.msra.gmra.mxu0 %vm232_vm4, %v2041_v7 }
 0x82e   :  { %1033 = vmatpush.msrb.mxu0 %v995_v12  ;;  %1170 = vmatpush.msrb.mxu3 %v1141_v0  ;;  %v1482_v0 = vld [vmem:[#allocation7 + $0xaf0] sm:$0xff] }
 0x830   :  { %1034 = vmatpush.msrb.mxu0 %v994_v15  ;;  %1171 = vmatpush.msrb.mxu3 %v1140_v1  ;;  %v1481_v1 = vld [vmem:[#allocation7 + $0xae8] sm:$0xff] }
 0x832   :  { %1172 = vmatpush.msrb.mxu3 %v1139_v55  ;;  %v1480_v55 = vld [vmem:[#allocation7 + $0xae0] sm:$0xff] }
 0x835   :  { %1714 = vmatmul.msk.f32.gmra.mxu0 %vm232_vm4, %v2047_v17 }
 0x83d   :  { %1715 = vmatmul.msk.f32.vlgmr.msrb.gmra.mxu0 %vm232_vm4, %v2077_v31 }
 0x845   :  { %1716 = vmatmul.msk.f32.gmra.mxu0 %vm232_vm4, %v2081_v34 }
 0x8aa   :  { %v1013_v46 = vpop.f32.mrf.mxu0 }
 0x8ab   :  { %1115 = vmatmul.f32.vlgmr.msrb.gmra.mxu2 %v1013_v46  ;;  %v1240_v46 = vld [vmem:[#allocation7 + $0x8f0] sm:$0xff] }
 0x8b2   :  { %v1016_v47 = vpop.f32.mrf.mxu0 }
 0x8b3   :  { %1118 = vmatmul.f32.gmra.mxu2 %v1016_v47  ;;  %v1239_v47 = vld [vmem:[#allocation7 + $0x8e8] sm:$0xff] }
 0x8ba   :  { %v1036_v48 = vpop.f32.mrf.mxu0 }
 0x8bb   :  { %1092 = vmatmul.f32.vlgmr.msrb.gmra.mxu1 %v1036_v48  ;;  %v1238_v48 = vld [vmem:[#allocation7 + $0x8e0] sm:$0xff] }
 0x8c2   :  { %v1039_v49 = vpop.f32.mrf.mxu0 }
 0x8c3   :  { %1095 = vmatmul.f32.gmra.mxu1 %v1039_v49  ;;  %v1237_v49 = vld [vmem:[#allocation7 + $0x8d8] sm:$0xff] }
 0x92e   :  { %v1116_v2 = vpop.f32.mrf.mxu2 }
 0x936   :  { %v1119_v9 = vpop.f32.mrf.mxu2 }
 0x938   :  { %v1093_v3 = vpop.f32.mrf.mxu1 }
 0x939   :  { %v1117_v4 = vadd.f32 %v1116_v2, %v1093_v3  ;;  %v1479_v2 = vld [vmem:[#allocation7 + $0xad8] sm:$0xff]  ;;  %v1477_v3 = vld [vmem:[#allocation7 + $0xac8] sm:$0xff] }
 0x93b   :  { %v1124_v5 = vadd.f32 %v1764_v53, %v1117_v4  ;;  %v1476_v4 = vld [vmem:[#allocation7 + $0xac0] sm:$0xff] }
 0x93d   :  { %v1128_v6 = vmin.f32 %v1124_v5, 0.0  ;;  %vm1126_vm6 = vcmp.gt.f32.partialorder %v1124_v5, 0.0 }
 0x93f   :  { %v1130_v8 = vmul.f32 1.442695, %v1128_v6  ;;  %v1474_v6 = vld [vmem:[#allocation7 + $0xab0] sm:$0xff] }
 0x940   :  { %v1096_v10 = vpop.f32.mrf.mxu1 }
 0x941   :  { %1817 = vpow2.f32 %v1130_v8  ;;  %v1120_v11 = vadd.f32 %v1119_v9, %v1096_v10  ;;  %v1473_v8 = vld [vmem:[#allocation7 + $0xaa8] sm:$0xff]  ;;  %v1472_v9 = vld [vmem:[#allocation7 + $0xaa0] sm:$0xff]  ;;  %v1471_v10 = vld [vmem:[#allocation7 + $0xa98] sm:$0xff] }
 0x943   :  { %v1125_v12 = vadd.f32 %v1764_v53, %v1120_v11  ;;  %v1478_v53 = vld [vmem:[#allocation7 + $0xad0] sm:$0xff] }
 0x944   :  { %v1470_v11 = vld [vmem:[#allocation7 + $0xa90] sm:$0xff] }
 0x945   :  { %v1129_v13 = vmin.f32 %v1125_v12, 0.0  ;;  %vm1127_vm7 = vcmp.gt.f32.partialorder %v1125_v12, 0.0 }
 0x947   :  { %v1818_v14 = vpop.eup %1817  ;;  %v1132_v15 = vmul.f32 1.442695, %v1129_v13  ;;  %v1468_v13 = vld [vmem:[#allocation7 + $0xa80] sm:$0xff] }
 0x948   :  { %v1717_v16 = vadd.f32 -1.0, %v1818_v14  ;;  %v1295_v14 = vld [vmem:[#allocation7 + $0x978] sm:$0xff] }
 0x949   :  { %1819 = vpow2.f32 %v1132_v15  ;;  %v1294_v15 = vld [vmem:[#allocation7 + $0x970] sm:$0xff]  ;;  %1298 = vmatpush.msra.mxu1 %v1295_v14  ;;  %v1416_v14 = vld [vmem:[#allocation7 + $0xa58] sm:$0xff] }
 0x94a   :  { %v1136_v18 = vsel %vm1126_vm6, %v1124_v5, %v1717_v16  ;;  %v1475_v5 = vld [vmem:[#allocation7 + $0xab8] sm:$0xff]  ;;  %v1293_v16 = vld [vmem:[#allocation7 + $0x968] sm:$0xff] }
 0x94b   :  { %1173 = vmatmul.f32.vlgmr.msrb.gmra.mxu3 %v1136_v18  ;;  %1299 = vmatpush.msra.mxu1 %v1294_v15  ;;  %v1292_v18 = vld [vmem:[#allocation7 + $0x960] sm:$0xff]  ;;  %v1403_v15 = vld [vmem:[#allocation7 + $0x9f8] sm:$0xff] }
 0x94d   :  { %1300 = vmatpush.msra.mxu1 %v1293_v16  ;;  %v1415_v16 = vld [vmem:[#allocation7 + $0xa50] sm:$0xff] }
 0x94f   :  { %v1820_v19 = vpop.eup %1819  ;;  %1301 = vmatpush.msra.mxu1 %v1292_v18  ;;  %v1402_v18 = vld [vmem:[#allocation7 + $0x9f0] sm:$0xff] }
 0x950   :  { %v1718_v20 = vadd.f32 -1.0, %v1820_v19 }
 0x952   :  { %v1137_v21 = vsel %vm1127_vm7, %v1125_v12, %v1718_v20  ;;  %v1469_v12 = vld [vmem:[#allocation7 + $0xa88] sm:$0xff] }
 0x953   :  { %1176 = vmatmul.f32.gmra.mxu3 %v1137_v21  ;;  %v1291_v21 = vld [vmem:[#allocation7 + $0x958] sm:$0xff] }
 0x954   :  { %1302 = vmatpush.msra.mxu1 %v1291_v21  ;;  %v1400_v21 = vld [vmem:[#allocation7 + $0x9e0] sm:$0xff] }
 0x9ce   :  { %v1174_v23 = vpop.f32.mrf.mxu3 }
 0x9cf   :  { %v1175_v24 = vadd.f32 %v1765_v22, %v1174_v23  ;;  %v1289_v23 = vld [vmem:[#allocation7 + $0x948] sm:$0xff] }
 0x9d1   :  { %v1182_v25 = vmin.f32 %v1175_v24, 0.0  ;;  %vm1180_vm8 = vcmp.gt.f32.partialorder %v1175_v24, 0.0 }
 0x9d3   :  { %v1184_v26 = vmul.f32 1.442695, %v1182_v25 }
 0x9d5   :  { %1821 = vpow2.f32 %v1184_v26  ;;  %v1288_v26 = vld [vmem:[#allocation7 + $0x940] sm:$0xff] }
 0x9d6   :  { %v1177_v27 = vpop.f32.mrf.mxu3 }
 0x9d7   :  { %v1178_v28 = vadd.f32 %v1765_v22, %v1177_v27  ;;  %v1290_v22 = vld [vmem:[#allocation7 + $0x950] sm:$0xff]  ;;  %v1287_v27 = vld [vmem:[#allocation7 + $0x938] sm:$0xff] }
 0x9d8   :  { %1303 = vmatpush.msra.mxu1 %v1290_v22  ;;  %v1398_v22 = vld [vmem:[#allocation7 + $0x9d0] sm:$0xff] }
 0x9d9   :  { %v1183_v29 = vmin.f32 %v1178_v28, 0.0  ;;  %vm1181_vm9 = vcmp.gt.f32.partialorder %v1178_v28, 0.0 }
 0x9da   :  { %1304 = vmatpush.msra.mxu1 %v1289_v23  ;;  %v1397_v23 = vld [vmem:[#allocation7 + $0x9c8] sm:$0xff] }
 0x9db   :  { %v1186_v30 = vmul.f32 1.442695, %v1183_v29  ;;  %v1822_v32 = vpop.eup %1821  ;;  %v1285_v29 = vld [vmem:[#allocation7 + $0x928] sm:$0xff] }
 0x9dc   :  { %v1719_v33 = vadd.f32 -1.0, %v1822_v32  ;;  %1305 = vmatpush.msra.mxu1 %v1288_v26  ;;  %v1283_v32 = vld [vmem:[#allocation7 + $0x918] sm:$0xff]  ;;  %v1394_v26 = vld [vmem:[#allocation7 + $0x9b0] sm:$0xff] }
 0x9dd   :  { %1823 = vpow2.f32 %v1186_v30  ;;  %v1284_v30 = vld [vmem:[#allocation7 + $0x920] sm:$0xff] }
 0x9de   :  { %v1190_v38 = vsel %vm1180_vm8, %v1175_v24, %v1719_v33  ;;  %1306 = vmatpush.msra.mxu1 %v1287_v27  ;;  %v1282_v33 = vld [vmem:[#allocation7 + $0x910] sm:$0xff]  ;;  %v1393_v27 = vld [vmem:[#allocation7 + $0x9a8] sm:$0xff] }
 0x9df   :  { %v1194_v42 = vmul.f32 %v1766_v37, %v1190_v38  ;;  %v1768_v38 = vld [vmem:[#allocation8 + $0x19] ss:$0 sm:$0xff] }
 0x9e1   :  { %v2088_v44 = vadd.f32 %v1767_v41, %v1194_v42 }
 0x9e3   :  { %v1824_v36 = vpop.eup %1823 }
 0x9e4   :  { %v1720_v39 = vadd.f32 -1.0, %v1824_v36  ;;  %v1281_v36 = vld [vmem:[#allocation7 + $0x908] sm:$0xff] }
 0x9e6   :  { %v1191_v35 = vsel %vm1181_vm9, %v1178_v28, %v1720_v39  ;;  %v1286_v28 = vld [vmem:[#allocation7 + $0x930] sm:$0xff] }
 0x9e7   :  { %v1195_v40 = vmul.f32 %v1766_v37, %v1191_v35  ;;  %1307 = vmatpush.msra.mxu1 %v1286_v28  ;;  %v1280_v37 = vld [vmem:[#allocation7 + $0x900] sm:$0xff]  ;;  %v1391_v28 = vld [vmem:[#allocation7 + $0x998] sm:$0xff] }
 0x9e9   :  { %v2085_v43 = vadd.f32 %v1767_v41, %v1195_v40  ;;  %1308 = vmatpush.msra.mxu1 %v1285_v29  ;;  %v1390_v29 = vld [vmem:[#allocation7 + $0x990] sm:$0xff] }
 0x9eb   :  { %1214 = vmatpush.msra.mxu0 %v2085_v43  ;;  %1309 = vmatpush.msra.mxu1 %v1284_v30  ;;  %v1389_v30 = vld [vmem:[#allocation7 + $0x988] sm:$0xff] }
 0x9ed   :  { %1215 = vmatpush.msra.mxu0 %v2088_v44  ;;  %1310 = vmatpush.msra.mxu1 %v1283_v32  ;;  %v1388_v32 = vld [vmem:[#allocation7 + $0x980] sm:$0xff] }
 0x9ee   :  { %1721 = vmatmul.msk.f32.vlgmr.msra.gmra.mxu0 %vm232_vm4, %v2041_v7 }
 0x9ef   :  { %1244 = vmatpush.msrb.mxu0 %v1241_v45  ;;  %1311 = vmatpush.msra.mxu1 %v1282_v33  ;;  %v1412_v33 = vld [vmem:[#allocation7 + $0xa38] sm:$0xff] }
 0x9f1   :  { %1245 = vmatpush.msrb.mxu0 %v1240_v46  ;;  %1312 = vmatpush.msra.mxu1 %v1281_v36  ;;  %v1411_v36 = vld [vmem:[#allocation7 + $0xa30] sm:$0xff] }
 0x9f3   :  { %1246 = vmatpush.msrb.mxu0 %v1239_v47  ;;  %1313 = vmatpush.msra.mxu1 %v1280_v37  ;;  %v1410_v37 = vld [vmem:[#allocation7 + $0xa28] sm:$0xff] }
 0x9f5   :  { %1247 = vmatpush.msrb.mxu0 %v1238_v48 }
 0x9f6   :  { %1722 = vmatmul.msk.f32.gmra.mxu0 %vm232_vm4, %v2047_v17 }
 0x9f7   :  { %1248 = vmatpush.msrb.mxu0 %v1237_v49 }
 0x9f9   :  { %1249 = vmatpush.msrb.mxu0 %v1236_v50 }
 0x9fb   :  { %1250 = vmatpush.msrb.mxu0 %v1235_v51 }
 0x9fd   :  { %1251 = vmatpush.msrb.mxu0 %v1234_v52  ;;  %v1769_v52 = vld [vmem:[#allocation8 + $0x1a] ss:$0 sm:$0xff] }
 0x9ff   :  { %1252 = vmatpush.msrb.mxu0 %v1233_v54 }
 0xa01   :  { %1253 = vmatpush.msrb.mxu0 %v1232_v56 }
 0xa03   :  { %1254 = vmatpush.msrb.mxu0 %v1231_v57 }
 0xa05   :  { %1255 = vmatpush.msrb.mxu0 %v1230_v58 }
 0xa07   :  { %1256 = vmatpush.msrb.mxu0 %v1229_v59 }
 0xa09   :  { %1257 = vmatpush.msrb.mxu0 %v1228_v60 }
 0xa0b   :  { %1258 = vmatpush.msrb.mxu0 %v1227_v61 }
 0xa0d   :  { %1259 = vmatpush.msrb.mxu0 %v1226_v62 }
 0xa0f   :  { %1484 = vmatpush.msra.mxu0 %v1483_v63 }
 0xa11   :  { %1485 = vmatpush.msra.mxu0 %v1482_v0 }
 0xa13   :  { %1486 = vmatpush.msra.mxu0 %v1481_v1 }
 0xa15   :  { %1487 = vmatpush.msra.mxu0 %v1480_v55  ;;  %v1770_v55 = vld [vmem:[#allocation8 + $0x1b] ss:$0 sm:$0xff] }
 0xa17   :  { %1488 = vmatpush.msra.mxu0 %v1479_v2 }
 0xa19   :  { %1489 = vmatpush.msra.mxu0 %v1478_v53 }
 0xa1b   :  { %1490 = vmatpush.msra.mxu0 %v1477_v3 }
 0xa1d   :  { %1491 = vmatpush.msra.mxu0 %v1476_v4 }
 0xa1f   :  { %1492 = vmatpush.msra.mxu0 %v1475_v5  ;;  %v1771_v5 = vld [vmem:[#allocation8 + $0x1c] ss:$0 sm:$0xff] }
 0xa21   :  { %1493 = vmatpush.msra.mxu0 %v1474_v6 }
 0xa23   :  { %1494 = vmatpush.msra.mxu0 %v1473_v8  ;;  %v1420_v8 = vld [vmem:[#allocation7 + $0xa78] sm:$0xff] }
 0xa24   :  { %1421 = vmatpush.msra.mxu2 %v1420_v8  ;;  %v1599_v8 = vld [vmem:[#allocation7 + $0xbd8] sm:$0xff] }
 0xa25   :  { %1495 = vmatpush.msra.mxu0 %v1472_v9 }
 0xa27   :  { %1496 = vmatpush.msra.mxu0 %v1471_v10  ;;  %v1419_v10 = vld [vmem:[#allocation7 + $0xa70] sm:$0xff] }
 0xa28   :  { %1422 = vmatpush.msra.mxu2 %v1419_v10 }
 0xa29   :  { %1497 = vmatpush.msra.mxu0 %v1470_v11  ;;  %v1418_v11 = vld [vmem:[#allocation7 + $0xa68] sm:$0xff] }
 0xa2a   :  { %1423 = vmatpush.msra.mxu2 %v1418_v11 }
 0xa2b   :  { %1498 = vmatpush.msra.mxu0 %v1469_v12 }
 0xa2d   :  { %1499 = vmatpush.msra.mxu0 %v1468_v13  ;;  %v1417_v13 = vld [vmem:[#allocation7 + $0xa60] sm:$0xff] }
 0xa2e   :  { %1424 = vmatpush.msra.mxu2 %v1417_v13 }
 0xa30   :  { %1425 = vmatpush.msra.mxu2 %v1416_v14 }
 0xa32   :  { %1426 = vmatpush.msra.mxu2 %v1415_v16 }
 0xa6b   :  { %v1217_v19 = vpop.f32.mrf.mxu0 }
 0xa6c   :  { %v1223_v20 = vmul.f32 0.0625, %v1217_v19  ;;  %v1414_v19 = vld [vmem:[#allocation7 + $0xa48] sm:$0xff] }
 0xa6d   :  { %1427 = vmatpush.msra.mxu2 %v1414_v19 }
 0xa6e   :  { %1260 = vmatmul.f32.vlgmr.msrb.gmra.mxu0 %v1223_v20  ;;  %v1401_v20 = vld [vmem:[#allocation7 + $0x9e8] sm:$0xff] }
 0xa73   :  { %v1220_v24 = vpop.f32.mrf.mxu0 }
 0xa74   :  { %v1224_v25 = vmul.f32 0.0625, %v1220_v24  ;;  %v1396_v24 = vld [vmem:[#allocation7 + $0x9c0] sm:$0xff] }
 0xa76   :  { %1263 = vmatmul.f32.gmra.mxu0 %v1224_v25  ;;  %v1395_v25 = vld [vmem:[#allocation7 + $0x9b8] sm:$0xff] }
 0xa7e   :  { %1500 = vmatmul.f32.vlgmr.msra.gmra.mxu0 %v2088_v44 }
 0xa86   :  { %1503 = vmatmul.f32.gmra.mxu0 %v2085_v43 }
 0xaeb   :  { %v1261_v39 = vpop.f32.mrf.mxu0 }
 0xaec   :  { %v1262_v35 = vadd.f32 %v1768_v38, %v1261_v39  ;;  %v1407_v39 = vld [vmem:[#allocation7 + $0xa10] sm:$0xff] }
 0xaee   :  { %v1269_v40 = vmin.f32 %v1262_v35, 0.0  ;;  %vm1267_vm10 = vcmp.gt.f32.partialorder %v1262_v35, 0.0 }
 0xaf0   :  { %v1271_v41 = vmul.f32 1.442695, %v1269_v40  ;;  %v1405_v40 = vld [vmem:[#allocation7 + $0xa00] sm:$0xff] }
 0xaf2   :  { %1825 = vpow2.f32 %v1271_v41 }
 0xaf3   :  { %v1264_v42 = vpop.f32.mrf.mxu0 }
 0xaf4   :  { %v1265_v43 = vadd.f32 %v1768_v38, %v1264_v42  ;;  %v1408_v38 = vld [vmem:[#allocation7 + $0xa18] sm:$0xff] }
 0xaf6   :  { %v1270_v44 = vmin.f32 %v1265_v43, 0.0  ;;  %vm1268_vm11 = vcmp.gt.f32.partialorder %v1265_v43, 0.0 }
 0xaf8   :  { %v1826_v45 = vpop.eup %1825  ;;  %v1273_v46 = vmul.f32 1.442695, %v1270_v44 }
 0xaf9   :  { %v1723_v47 = vadd.f32 -1.0, %v1826_v45  ;;  %v1541_v45 = vld [vmem:[#allocation7 + $0xb78] sm:$0xff] }
 0xafa   :  { %1827 = vpow2.f32 %v1273_v46  ;;  %1544 = vmatpush.msrb.mxu1 %v1541_v45  ;;  %v1540_v46 = vld [vmem:[#allocation7 + $0xb70] sm:$0xff]  ;;  %v1774_v45 = vld [vmem:[#allocation8 + $0x1f] ss:$0 sm:$0xff] }
 0xafb   :  { %v1277_v48 = vsel %vm1267_vm10, %v1262_v35, %v1723_v47  ;;  %v1406_v35 = vld [vmem:[#allocation7 + $0xa08] sm:$0xff] }
 0xafc   :  { %1314 = vmatmul.f32.vlgmr.msra.gmra.mxu1 %v1277_v48  ;;  %v1539_v47 = vld [vmem:[#allocation7 + $0xb68] sm:$0xff]  ;;  %v1538_v48 = vld [vmem:[#allocation7 + $0xb60] sm:$0xff] }
 0xafd   :  { %1545 = vmatpush.msrb.mxu1 %v1540_v46 }
 0xaff   :  { %1546 = vmatpush.msrb.mxu1 %v1539_v47 }
 0xb00   :  { %v1828_v49 = vpop.eup %1827 }
 0xb01   :  { %v1724_v50 = vadd.f32 -1.0, %v1828_v49  ;;  %v1537_v49 = vld [vmem:[#allocation7 + $0xb58] sm:$0xff]  ;;  %1547 = vmatpush.msrb.mxu1 %v1538_v48  ;;  %v1775_v48 = vld [vmem:[#allocation8 + $0x20] ss:$0 sm:$0xff] }
 0xb03   :  { %v1278_v51 = vsel %vm1268_vm11, %v1265_v43, %v1724_v50  ;;  %1548 = vmatpush.msrb.mxu1 %v1537_v49  ;;  %v1536_v50 = vld [vmem:[#allocation7 + $0xb50] sm:$0xff] }
 0xb04   :  { %1317 = vmatmul.f32.gmra.mxu1 %v1278_v51  ;;  %v1535_v51 = vld [vmem:[#allocation7 + $0xb48] sm:$0xff] }
 0xb05   :  { %1549 = vmatpush.msrb.mxu1 %v1536_v50 }
 0xb07   :  { %1550 = vmatpush.msrb.mxu1 %v1535_v51 }
 0xb79   :  { %v1315_v54 = vpop.f32.mrf.mxu1 }
 0xb7a   :  { %v1316_v56 = vadd.f32 %v1769_v52, %v1315_v54  ;;  %v1533_v54 = vld [vmem:[#allocation7 + $0xb38] sm:$0xff] }
 0xb7c   :  { %v1323_v57 = vmin.f32 %v1316_v56, 0.0  ;;  %vm1321_vm12 = vcmp.gt.f32.partialorder %v1316_v56, 0.0 }
 0xb7e   :  { %v1325_v58 = vmul.f32 1.442695, %v1323_v57  ;;  %v1531_v57 = vld [vmem:[#allocation7 + $0xb28] sm:$0xff] }
 0xb80   :  { %1829 = vpow2.f32 %v1325_v58  ;;  %v1530_v58 = vld [vmem:[#allocation7 + $0xb20] sm:$0xff] }
 0xb81   :  { %v1318_v59 = vpop.f32.mrf.mxu1 }
 0xb82   :  { %v1319_v60 = vadd.f32 %v1769_v52, %v1318_v59  ;;  %v1534_v52 = vld [vmem:[#allocation7 + $0xb40] sm:$0xff]  ;;  %v1529_v59 = vld [vmem:[#allocation7 + $0xb18] sm:$0xff] }
 0xb83   :  { %1551 = vmatpush.msrb.mxu1 %v1534_v52 }
 0xb84   :  { %v1324_v61 = vmin.f32 %v1319_v60, 0.0  ;;  %vm1322_vm13 = vcmp.gt.f32.partialorder %v1319_v60, 0.0 }
 0xb85   :  { %1552 = vmatpush.msrb.mxu1 %v1533_v54 }
 0xb86   :  { %v1327_v62 = vmul.f32 1.442695, %v1324_v61  ;;  %v1830_v63 = vpop.eup %1829  ;;  %v1527_v61 = vld [vmem:[#allocation7 + $0xb08] sm:$0xff] }
 0xb87   :  { %v1725_v0 = vadd.f32 -1.0, %v1830_v63  ;;  %v1603_v63 = vld [vmem:[#allocation7 + $0xbf8] sm:$0xff] }
 0xb88   :  { %1831 = vpow2.f32 %v1327_v62  ;;  %v1526_v62 = vld [vmem:[#allocation7 + $0xb00] sm:$0xff] }
 0xb89   :  { %v1331_v2 = vsel %vm1321_vm12, %v1316_v56, %v1725_v0  ;;  %v1532_v56 = vld [vmem:[#allocation7 + $0xb30] sm:$0xff] }
 0xb8a   :  { %v1335_v6 = vmul.f32 %v1770_v55, %v1331_v2  ;;  %1553 = vmatpush.msrb.mxu1 %v1532_v56  ;;  %v1602_v0 = vld [vmem:[#allocation7 + $0xbf0] sm:$0xff]  ;;  %v1501_v2 = vpop.f32.mrf.mxu0 }
 0xb8c   :  { %v1339_v12 = vadd.f32 %v1771_v5, %v1335_v6  ;;  %1554 = vmatpush.msrb.mxu1 %v1531_v57 }
 0xb8e   :  { %v1832_v1 = vpop.eup %1831  ;;  %1555 = vmatpush.msrb.mxu1 %v1530_v58 }
 0xb8f   :  { %v1726_v53 = vadd.f32 -1.0, %v1832_v1 }
 0xb90   :  { %1556 = vmatpush.msrb.mxu1 %v1529_v59  ;;  %v1629_v59 = vlaneseq }
 0xb91   :  { %v1332_v3 = vsel %vm1322_vm13, %v1319_v60, %v1726_v53  ;;  %v1528_v60 = vld [vmem:[#allocation7 + $0xb10] sm:$0xff] }
 0xb92   :  { %v1336_v4 = vmul.f32 %v1770_v55, %v1332_v3  ;;  %1557 = vmatpush.msrb.mxu1 %v1528_v60  ;;  %v1601_v55 = vld [vmem:[#allocation7 + $0xbe8] sm:$0xff]  ;;  %v1630_v60 = vand.u32 127, %v1629_v59 }
 0xb94   :  { %v1340_v9 = vadd.f32 %v1771_v5, %v1336_v4  ;;  %1558 = vmatpush.msrb.mxu1 %v1527_v61  ;;  %v1772_v4 = vld [vmem:[#allocation8 + $0x1d] ss:$0 sm:$0xff]  ;;  %v1600_v5 = vld [vmem:[#allocation7 + $0xbe0] sm:$0xff]  ;;  %vm1631_vm1 = vcmp.lt.s32.totalorder %v1630_v60, 8 }
 0xb95   :  { %v1776_v61 = vld [vmem:[#allocation8 + $0x21] ss:$0 sm:$0xff] }
 0xb96   :  { %1355 = vmatpush.msra.mxu3 %v1340_v9  ;;  %1559 = vmatpush.msrb.mxu1 %v1526_v62 }
 0xb98   :  { %1356 = vmatpush.msra.mxu3 %v1339_v12 }
 0xb99   :  { %1727 = vmatmul.msk.f32.vlgmr.msra.gmra.mxu3 %vm232_vm4, %v2041_v7  ;;  %v1399_v7 = vld [vmem:[#allocation7 + $0x9d8] sm:$0xff] }
 0xb9a   :  { %1378 = vmatpush.msrb.mxu3 %v1340_v9 }
 0xb9c   :  { %1379 = vmatpush.msrb.mxu3 %v1339_v12 }
 0xb9e   :  { %1444 = vmatpush.msra.mxu3 %v1403_v15  ;;  %v1504_v15 = vpop.f32.mrf.mxu0 }
 0xba0   :  { %1445 = vmatpush.msra.mxu3 %v1402_v18 }
 0xba1   :  { %1728 = vmatmul.msk.f32.gmra.mxu3 %vm232_vm4, %v2047_v17  ;;  %v1392_v17 = vld [vmem:[#allocation7 + $0x9a0] sm:$0xff] }
 0xba2   :  { %1446 = vmatpush.msra.mxu3 %v1401_v20 }
 0xba4   :  { %1447 = vmatpush.msra.mxu3 %v1400_v21 }
 0xba6   :  { %1448 = vmatpush.msra.mxu3 %v1399_v7 }
 0xba8   :  { %1449 = vmatpush.msra.mxu3 %v1398_v22 }
 0xba9   :  { %1729 = vmatmul.msk.f32.vlgmr.msrb.gmra.mxu3 %vm232_vm4, %v2077_v31  ;;  %v1413_v31 = vld [vmem:[#allocation7 + $0xa40] sm:$0xff] }
 0xbaa   :  { %1450 = vmatpush.msra.mxu3 %v1397_v23  ;;  %1428 = vmatpush.msra.mxu2 %v1413_v31  ;;  %v1592_v31 = vld [vmem:[#allocation7 + $0xba0] sm:$0xff] }
 0xbac   :  { %1451 = vmatpush.msra.mxu3 %v1396_v24  ;;  %1429 = vmatpush.msra.mxu2 %v1412_v33  ;;  %v1590_v33 = vld [vmem:[#allocation7 + $0xb90] sm:$0xff] }
 0xbae   :  { %1452 = vmatpush.msra.mxu3 %v1395_v25  ;;  %1430 = vmatpush.msra.mxu2 %v1411_v36  ;;  %v1589_v36 = vld [vmem:[#allocation7 + $0xb88] sm:$0xff] }
 0xbb0   :  { %1453 = vmatpush.msra.mxu3 %v1394_v26  ;;  %1431 = vmatpush.msra.mxu2 %v1410_v37  ;;  %v1598_v26 = vld [vmem:[#allocation7 + $0xbd0] sm:$0xff]  ;;  %v1588_v37 = vld [vmem:[#allocation7 + $0xb80] sm:$0xff] }
 0xbb1   :  { %1730 = vmatmul.msk.f32.gmra.mxu3 %vm232_vm4, %v2081_v34  ;;  %v1409_v34 = vld [vmem:[#allocation7 + $0xa20] sm:$0xff] }
 0xbb2   :  { %1454 = vmatpush.msra.mxu3 %v1393_v27  ;;  %1432 = vmatpush.msra.mxu2 %v1409_v34  ;;  %v1597_v27 = vld [vmem:[#allocation7 + $0xbc8] sm:$0xff]  ;;  %v1773_v34 = vld [vmem:[#allocation8 + $0x1e] ss:$0 sm:$0xff] }
 0xbb4   :  { %1455 = vmatpush.msra.mxu3 %v1392_v17  ;;  %1433 = vmatpush.msra.mxu2 %v1408_v38  ;;  %v1596_v17 = vld [vmem:[#allocation7 + $0xbc0] sm:$0xff] }
 0xbb6   :  { %1456 = vmatpush.msra.mxu3 %v1391_v28  ;;  %1434 = vmatpush.msra.mxu2 %v1407_v39  ;;  %v1595_v28 = vld [vmem:[#allocation7 + $0xbb8] sm:$0xff] }
 0xbb8   :  { %1457 = vmatpush.msra.mxu3 %v1390_v29  ;;  %1435 = vmatpush.msra.mxu2 %v1406_v35  ;;  %v1594_v29 = vld [vmem:[#allocation7 + $0xbb0] sm:$0xff] }
 0xbba   :  { %1458 = vmatpush.msra.mxu3 %v1389_v30  ;;  %1436 = vmatpush.msra.mxu2 %v1405_v40  ;;  %v1593_v30 = vld [vmem:[#allocation7 + $0xba8] sm:$0xff] }
 0xbbc   :  { %1459 = vmatpush.msra.mxu3 %v1388_v32  ;;  %1606 = vmatpush.msrb.mxu2 %v1603_v63  ;;  %v1591_v32 = vld [vmem:[#allocation7 + $0xb98] sm:$0xff] }
 0xbbe   :  { %1607 = vmatpush.msrb.mxu2 %v1602_v0 }
 0xbc0   :  { %1608 = vmatpush.msrb.mxu2 %v1601_v55 }
 0xbc2   :  { %1609 = vmatpush.msrb.mxu2 %v1600_v5 }
 0xbc4   :  { %1610 = vmatpush.msrb.mxu2 %v1599_v8 }
 0xbc6   :  { %1611 = vmatpush.msrb.mxu2 %v1598_v26 }
 0xbc8   :  { %1612 = vmatpush.msrb.mxu2 %v1597_v27 }
 0xbca   :  { %1613 = vmatpush.msrb.mxu2 %v1596_v17 }
 0xbcc   :  { %1614 = vmatpush.msrb.mxu2 %v1595_v28 }
 0xbce   :  { %1615 = vmatpush.msrb.mxu2 %v1594_v29 }
 0xbd0   :  { %1616 = vmatpush.msrb.mxu2 %v1593_v30 }
 0xbd2   :  { %1617 = vmatpush.msrb.mxu2 %v1592_v31 }
 0xbd4   :  { %1618 = vmatpush.msrb.mxu2 %v1591_v32 }
 0xbd6   :  { %1619 = vmatpush.msrb.mxu2 %v1590_v33 }
 0xbd8   :  { %1620 = vmatpush.msrb.mxu2 %v1589_v36 }
 0xbda   :  { %1621 = vmatpush.msrb.mxu2 %v1588_v37 }
 0xc1c   :  { %v1358_v41 = vpop.f32.mrf.mxu3 }
 0xc1d   :  { %1460 = vmatmul.f32.vlgmr.msra.gmra.mxu3 %v1358_v41 }
 0xc24   :  { %v1361_v42 = vpop.f32.mrf.mxu3 }
 0xc25   :  { %1463 = vmatmul.f32.gmra.mxu3 %v1361_v42 }
 0xc2c   :  { %v1381_v43 = vpop.f32.mrf.mxu3 }
 0xc2d   :  { %1437 = vmatmul.f32.vlgmr.msra.gmra.mxu2 %v1381_v43 }
 0xc34   :  { %v1384_v44 = vpop.f32.mrf.mxu3 }
 0xc35   :  { %1440 = vmatmul.f32.gmra.mxu2 %v1384_v44 }
 0xca0   :  { %v1461_v1 = vpop.f32.mrf.mxu3 }
 0xca8   :  { %v1464_v11 = vpop.f32.mrf.mxu3 }
 0xcb0   :  { %v1438_v53 = vpop.f32.mrf.mxu2 }
 0xcb1   :  { %v1462_v3 = vadd.f32 %v1461_v1, %v1438_v53 }
 0xcb3   :  { %v1507_v6 = vadd.f32 %v1501_v2, %v1462_v3 }
 0xcb5   :  { %v1511_v9 = vadd.f32 %v1772_v4, %v1507_v6 }
 0xcb7   :  { %v1515_v10 = vmin.f32 %v1511_v9, 0.0  ;;  %vm1513_vm4 = vcmp.gt.f32.partialorder %v1511_v9, 0.0 }
 0xcb8   :  { %v1441_v12 = vpop.f32.mrf.mxu2 }
 0xcb9   :  { %v1517_v13 = vmul.f32 1.442695, %v1515_v10  ;;  %v1465_v14 = vadd.f32 %v1464_v11, %v1441_v12 }
 0xcbb   :  { %v1508_v16 = vadd.f32 %v1504_v15, %v1465_v14  ;;  %1833 = vpow2.f32 %v1517_v13 }
 0xcbd   :  { %v1512_v18 = vadd.f32 %v1772_v4, %v1508_v16 }
 0xcbf   :  { %v1516_v19 = vmin.f32 %v1512_v18, 0.0  ;;  %vm1514_vm14 = vcmp.gt.f32.partialorder %v1512_v18, 0.0 }
 0xcc1   :  { %v1834_v20 = vpop.eup %1833  ;;  %v1519_v21 = vmul.f32 1.442695, %v1516_v19 }
 0xcc2   :  { %v1731_v7 = vadd.f32 -1.0, %v1834_v20 }
 0xcc3   :  { %1835 = vpow2.f32 %v1519_v21 }
 0xcc4   :  { %v1523_v22 = vsel %vm1513_vm4, %v1511_v9, %v1731_v7 }
 0xcc5   :  { %1560 = vmatmul.f32.vlgmr.msrb.gmra.mxu1 %v1523_v22 }
 0xcc9   :  { %v1836_v23 = vpop.eup %1835 }
 0xcca   :  { %v1732_v24 = vadd.f32 -1.0, %v1836_v23 }
 0xccc   :  { %v1524_v25 = vsel %vm1514_vm14, %v1512_v18, %v1732_v24 }
 0xccd   :  { %1563 = vmatmul.f32.gmra.mxu1 %v1524_v25 }
 0xd42   :  { %v1561_v38 = vpop.f32.mrf.mxu1 }
 0xd43   :  { %v1562_v39 = vadd.f32 %v1773_v34, %v1561_v38 }
 0xd45   :  { %v1569_v35 = vmin.f32 %v1562_v39, 0.0  ;;  %vm1567_vm15 = vcmp.gt.f32.partialorder %v1562_v39, 0.0 }
 0xd47   :  { %v1571_v40 = vmul.f32 1.442695, %v1569_v35 }
 0xd49   :  { %1837 = vpow2.f32 %v1571_v40 }
 0xd4a   :  { %v1564_v41 = vpop.f32.mrf.mxu1 }
 0xd4b   :  { %v1565_v42 = vadd.f32 %v1773_v34, %v1564_v41 }
 0xd4d   :  { %v1570_v43 = vmin.f32 %v1565_v42, 0.0  ;;  %vm1568_vm0 = vcmp.gt.f32.partialorder %v1565_v42, 0.0 }
 0xd4f   :  { %v1838_v44 = vpop.eup %1837  ;;  %v1573_v46 = vmul.f32 1.442695, %v1570_v43 }
 0xd50   :  { %v1733_v47 = vadd.f32 -1.0, %v1838_v44 }
 0xd51   :  { %1839 = vpow2.f32 %v1573_v46 }
 0xd52   :  { %v1577_v49 = vsel %vm1567_vm15, %v1562_v39, %v1733_v47 }
 0xd53   :  { %v1581_v50 = vmul.f32 %v1774_v45, %v1577_v49 }
 0xd55   :  { %v1585_v51 = vadd.f32 %v1775_v48, %v1581_v50 }
 0xd57   :  { %v1840_v52 = vpop.eup %1839  ;;  %1622 = vmatmul.f32.vlgmr.msrb.gmra.mxu2 %v1585_v51 }
 0xd58   :  { %v1734_v54 = vadd.f32 -1.0, %v1840_v52 }
 0xd5a   :  { %v1578_v56 = vsel %vm1568_vm0, %v1565_v42, %v1734_v54 }
 0xd5b   :  { %v1582_v57 = vmul.f32 %v1774_v45, %v1578_v56 }
 0xd5d   :  { %v1586_v58 = vadd.f32 %v1775_v48, %v1582_v57 }
 0xd5f   :  { %1625 = vmatmul.f32.gmra.mxu2 %v1586_v58 }
 0xdda   :  { %v1623_v62 = vpop.f32.mrf.mxu2 }
 0xddb   :  { %v1624_v63 = vadd.f32 %v1776_v61, %v1623_v62 }
 0xddd   :  { %v1632_v0 = vsel %vm1631_vm1, %v1624_v63, -1e+30 }
 0xdde   :  { %1634 = vmax.xlane.f32.xlu1 %v1632_v0 }
 0xde2   :  { %v1626_v1 = vpop.f32.mrf.mxu2 }
 0xde3   :  { %v1627_v55 = vadd.f32 %v1776_v61, %v1626_v1 }
 0xde5   :  { %v1633_v2 = vsel %vm1631_vm1, %v1627_v55, -1e+30 }
 0xde6   :  { %1636 = vmax.xlane.f32.xlu1 %v1633_v2 }
 0xe51   :  { %v1635_v53 = vpop.xlane.xlu1 %1634 }
 0xe52   :  { %v1638_v3 = vsub.f32 %v1632_v0, %v1635_v53 }
 0xe54   :  { %v1640_v4 = vmul.f32 1.442695, %v1638_v3 }
 0xe56   :  { %1841 = vpow2.f32 %v1640_v4 }
 0xe59   :  { %v1637_v5 = vpop.xlane.xlu1 %1636 }
 0xe5a   :  { %v1639_v6 = vsub.f32 %v1633_v2, %v1637_v5 }
 0xe5c   :  { %v1842_v8 = vpop.eup %1841  ;;  %v1642_v9 = vmul.f32 1.442695, %v1639_v6 }
 0xe5d   :  { %v1644_v10 = vsel %vm1631_vm1, %v1842_v8, 0.0 }
 0xe5e   :  { %1843 = vpow2.f32 %v1642_v9  ;;  %1646 = vadd.xlane.f32.xlu2 %v1644_v10 }
 0xe64   :  { %v1844_v11 = vpop.eup %1843 }
 0xe65   :  { %v1645_v12 = vsel %vm1631_vm1, %v1844_v11, 0.0 }
 0xe66   :  { %1648 = vadd.xlane.f32.xlu2 %v1645_v12 }
 0xed1   :  { %v1647_v13 = vpop.xlane.xlu2 %1646 }
 0xed2   :  { %1845 = vlog2.f32 %v1647_v13 }
 0xed8   :  { %v1846_v14 = vpop.eup %1845 }
 0xed9   :  { %v1651_v15 = vmul.f32 0.6931472, %v1846_v14  ;;  %v1649_v16 = vpop.xlane.xlu2 %1648 }
 0xeda   :  { %1847 = vlog2.f32 %v1649_v16 }
 0xedb   :  { %v1654_v18 = vadd.f32 %v1651_v15, %v1635_v53 }
 0xedd   :  { %v1656_v19 = vsub.f32 %v1624_v63, %v1654_v18 }
 0xedf   :  { %v1658_v20 = vsel %vm1631_vm1, %v1656_v19, 0.0 }
 0xee0   :  { %v1848_v21 = vpop.eup %1847  ;;  %1660 = vst [vmem:[#allocation10] sm:$0xff] %v1658_v20 }
 0xee1   :  { %v1653_v7 = vmul.f32 0.6931472, %v1848_v21 }
 0xee3   :  { %v1655_v22 = vadd.f32 %v1653_v7, %v1637_v5 }
 0xee5   :  { %v1657_v23 = vsub.f32 %v1627_v55, %v1655_v22 }
 0xee7   :  { %v1659_v24 = vsel %vm1631_vm1, %v1657_v23, 0.0 }
 0xee8   :  { %1661 = vst [vmem:[#allocation10 + $0x8] sm:$0xff] %v1659_v24 }
 0xee9   :  { %1674 = dma.vmem_to_hbm [thread:$0]  %s1667_s8, 256, %s1669_s11, [#allocation4], %s1980_s23, %s1980_s23, %s1981_s24  }
 0xeea   :  { %1977 = dma.done.wait [#allocation4], 256  }
 0xeeb   :  { %1978 = vsyncadd [#allocation4], 4294967040 }
 0xeec   :  { %1679 = vsyncpa [#allocation3], 1 }
 0xeed   :  { %1680 = vsyncpa [#allocation6], 1 }
 0xeee   :  { %1681 = vsyncpa [#allocation9], 1 }
 0xeef   :  { %1682 = vsyncpa [#allocation4], 1 }

</bundles_post_ra>
